<compile_context>
chip_gen: v5e
topology: v5e:2x2
jax: 0.10.0
libtpu: 0.0.40
codegen_flags: <defaults>
</compile_context>

<pallas_src>
import math

import jax
import jax.numpy as jnp
import numpy as np
from jax.experimental import pallas as pl
from jax.experimental.pallas import tpu as pltpu

EPS = 1e-5  # nn.LayerNorm default eps


def _round_up(x, m):
    return ((x + m - 1) // m) * m


def _erf(x):
    # Abramowitz & Stegun 7.1.26 polynomial (|err| < 1.5e-7): f32-accurate erf so we
    # reproduce PyTorch's exact (non-tanh) GELU; the exp() routes to the EUP slot.
    a1, a2, a3, a4, a5 = 0.254829592, -0.284496736, 1.421413741, -1.453152027, 1.061405429
    p = 0.3275911
    sgn = jnp.where(x >= 0.0, 1.0, -1.0)
    ax = jnp.abs(x)
    t = 1.0 / (1.0 + p * ax)
    poly = ((((a5 * t + a4) * t + a3) * t + a2) * t + a1) * t
    return sgn * (1.0 - poly * jnp.exp(-ax * ax))


def _gelu_exact(x):
    return 0.5 * x * (1.0 + _erf(x * (1.0 / math.sqrt(2.0))))


def _layernorm(x, g, b):
    mu = jnp.mean(x, axis=-1, keepdims=True)
    var = jnp.mean((x - mu) ** 2, axis=-1, keepdims=True)
    return (x - mu) * jax.lax.rsqrt(var + EPS) * g + b


def make_kernel(num_heads, n_tokens, n_padded):
    """Grid = (batch tiles, token tiles).  Token axis is an online-softmax reduction."""

    def kernel(patch_ref, cls_ref,
               q0_ref, g1_ref, b1_ref,
               wk_ref, bk_ref, wv_ref, bv_ref,
               hms_ref, hmt_ref,
               wp_ref, bp_ref, g2_ref, b2_ref,
               wfc1_ref, bfc1_ref, wfc2_ref, bfc2_ref,
               wlp_ref, wlc_ref, blin_ref,
               out_ref,
               m_sc, l_sc, ov_sc):
        n = pl.program_id(1)
        n_steps = pl.num_programs(1)
        Bt, Nt, D = patch_ref.shape

        @pl.when(n == 0)
        def _():
            m_sc[...] = jnp.full(m_sc.shape, -1e30, m_sc.dtype)
            l_sc[...] = jnp.zeros(l_sc.shape, l_sc.dtype)
            ov_sc[...] = jnp.zeros(ov_sc.shape, ov_sc.dtype)

        # ---- K projection, head scores, online softmax update (v2 not yet live) ----
        x = patch_ref[...].astype(jnp.float32)                         # (Bt, Nt, D)
        xn = _layernorm(x, g1_ref[...], b1_ref[...])                    # f32 LayerNorm
        x2 = xn.reshape(Bt * Nt, D).astype(jnp.bfloat16)                # bf16 MXU operand
        k2 = jnp.dot(x2, wk_ref[...], preferred_element_type=jnp.float32) + bk_ref[...]
        # scores[b*Nt+t, h] = sum_d k2[., d] * q_proj[d]/sqrt(hd) * onehot[d, h]
        # (output width H << 128 lanes is MXU-inefficient but cheap; left as-is.)
        scores = jnp.dot(k2, hms_ref[...], preferred_element_type=jnp.float32)
        scores = scores.reshape(Bt, Nt, num_heads)
        if n_padded != n_tokens:                                        # mask padded tokens
            pos = n * Nt + jax.lax.broadcasted_iota(jnp.int32, (Bt, Nt, num_heads), 1)
            scores = jnp.where(pos < n_tokens, scores, -1e30)
        m_prev = m_sc[...]                                              # (Bt, H)
        m_new = jnp.maximum(m_prev, jnp.max(scores, axis=1))
        alpha = jnp.exp(m_prev - m_new)                                 # (Bt, H)
        p = jnp.exp(scores - m_new[:, None, :])                         # (Bt, Nt, H)
        l_sc[...] = alpha * l_sc[...] + jnp.sum(p, axis=1)
        m_sc[...] = m_new

        # ---- V projection and running weighted-value accumulator ----
        v2 = jnp.dot(x2, wv_ref[...], preferred_element_type=jnp.float32) + bv_ref[...]
        p_full = jnp.dot(p.reshape(Bt * Nt, num_heads), hmt_ref[...],
                         preferred_element_type=jnp.float32)            # (Bt*Nt, D)
        ov_tile = jnp.sum((p_full * v2).reshape(Bt, Nt, D), axis=1)     # (Bt, D)
        alpha_full = jnp.dot(alpha, hmt_ref[...],
                             preferred_element_type=jnp.float32)        # (Bt, D)
        ov_sc[...] = alpha_full * ov_sc[...] + ov_tile

        # ---- finalize: normalize, proj, residuals, MLP, classifier ----
        @pl.when(n == n_steps - 1)
        def _():
            inv_l = pl.reciprocal(l_sc[...], approx=True)               # (Bt, H), EUP
            inv_full = jnp.dot(inv_l, hmt_ref[...], preferred_element_type=jnp.float32)
            ov = (ov_sc[...] * inv_full).astype(jnp.bfloat16)           # (Bt, D)
            attn = jnp.dot(ov, wp_ref[...],
                           preferred_element_type=jnp.float32) + bp_ref[...]
            q1 = q0_ref[...] + attn                                     # residual 1, (Bt, D)
            q1n = _layernorm(q1, g2_ref[...], b2_ref[...]).astype(jnp.bfloat16)
            h1 = _gelu_exact(jnp.dot(q1n, wfc1_ref[...],
                                     preferred_element_type=jnp.float32) + bfc1_ref[...])
            h2 = jnp.dot(h1.astype(jnp.bfloat16), wfc2_ref[...],
                         preferred_element_type=jnp.float32) + bfc2_ref[...]
            q2 = (q1 + h2).astype(jnp.bfloat16)                         # pooled output
            # classifier on concat([pooled, class_token]) without an explicit concat
            logits = (jnp.dot(q2, wlp_ref[...], preferred_element_type=jnp.float32)
                      + jnp.dot(cls_ref[...], wlc_ref[...],
                                preferred_element_type=jnp.float32)
                      + blin_ref[...])                                  # (Bt, C_pad)
            out_ref[...] = logits

    return kernel


def attentive_classifier_forward(patch_tokens, class_token, params, num_heads,
                                 block_b=64, block_n=512):
    B, N, D = patch_tokens.shape
    H = num_heads
    hd = D // H
    HID = params["wfc1"].shape[1]
    C = params["wlin"].shape[1]
    bf, f32 = jnp.bfloat16, jnp.float32

    # ---------- wrapper-side (plain XLA) preprocessing ----------
    # Hoist the batch-invariant query projection and fold it (with 1/sqrt(hd)) into the
    # one-hot head-membership mask used for the head-vectorized scores.
    qh = params["q0"] @ params["wq"] + params["bq"]                     # (1, D)
    hm = jnp.repeat(jnp.eye(H, dtype=f32), hd, axis=0)                  # (D, H)
    hm_scaled = hm * (qh[0] * (1.0 / math.sqrt(hd)))[:, None]           # (D, H)
    hmt = hm.T                                                          # (H, D): head->lane broadcast
    # Split the fused kv weight/bias so the kernel never slices the lane dimension.
    wk, wv = params["wkv"][:, :D], params["wkv"][:, D:]
    bk, bv = params["bkv"][:, :D], params["bkv"][:, D:]
    # Lane-dense classifier head: pad classes to a multiple of 128, split pooled/cls halves.
    C_pad = _round_up(max(C, 128), 128)
    wlp = jnp.pad(params["wlin"][:D], ((0, 0), (0, C_pad - C))).astype(bf)
    wlc = jnp.pad(params["wlin"][D:], ((0, 0), (0, C_pad - C))).astype(bf)
    blin = jnp.pad(params["blin"], ((0, 0), (0, C_pad - C)))

    # Big matmul operands in bf16 (f32 accumulation in-kernel); biases / LN params in f32.
    weights = [params["q0"], params["g1"], params["b1"],
               wk.astype(bf), bk, wv.astype(bf), bv,
               hm_scaled, hmt,
               params["wp"].astype(bf), params["bp"], params["g2"], params["b2"],
               params["wfc1"].astype(bf), params["bfc1"],
               params["wfc2"].astype(bf), params["bfc2"],
               wlp, wlc, blin]

    # ---------- generation-aware VMEM budget & tile sizing ----------
    try:
        phys = int(getattr(pltpu.get_tpu_info(), "vmem_capacity_bytes", 64 << 20))
    except Exception:  # pragma: no cover - conservative fallback (v7x per-TC VMEM)
        phys = 64 << 20
    # 75% of physical: ~48 MiB on v7x (64 MiB parts), ~96 MiB on v5e/v6e (128 MiB parts);
    # the rest is left for Mosaic internal scratch.
    vmem_cap = max(32 << 20, phys * 3 // 4)

    weight_bytes = sum(int(np.prod(w.shape)) * w.dtype.itemsize for w in weights)

    def footprint(bt, nt):
        io = 2 * (bt * nt * D * 2 + bt * D * 2 + bt * C_pad * 4)        # double-buffered blocks
        temps = 6 * bt * nt * D * 4 + 6 * bt * max(D, HID, C_pad) * 4   # in-kernel f32 temporaries
        scratch = bt * (2 * H + D) * 4
        # NOTE: budgets 2x for the resident weights in case the constant-index inputs
        # are double-buffered by the pipeline (single-buffering them would fund a larger Bt).
        return 2 * weight_bytes + io + temps + scratch

    Bt = min(_round_up(max(block_b, 8), 8), max(8, _round_up(B, 8)))
    Nt = min(_round_up(max(block_n, 8), 8), _round_up(N, 8))
    while footprint(Bt, Nt) > vmem_cap and (Bt > 8 or Nt > 8):
        if Nt > 8:
            Nt = _round_up(Nt // 2, 8)     # shrink the token tile first (keep MXU rows filled)
        else:
            Bt = max(8, Bt // 2)

    B_pad = _round_up(B, Bt)               # v7x: prefer B large enough that B_pad/Bt >= 2 (2 TCs)
    N_pad = _round_up(N, Nt)
    patch_p = jnp.pad(patch_tokens, ((0, B_pad - B), (0, N_pad - N), (0, 0))).astype(bf)
    cls_p = jnp.pad(class_token, ((0, B_pad - B), (0, 0))).astype(bf)

    def resident_spec(arr):
        nd = arr.ndim
        # Constant index_map => weight stays resident in VMEM across all grid steps.
        return pl.BlockSpec(arr.shape, lambda b, n, _nd=nd: (0,) * _nd)

    in_specs = ([pl.BlockSpec((Bt, Nt, D), lambda b, n: (b, n, 0)),
                 pl.BlockSpec((Bt, D), lambda b, n: (b, 0))]
                + [resident_spec(w) for w in weights])
    out_spec = pl.BlockSpec((Bt, C_pad), lambda b, n: (b, 0))

    grid = (B_pad // Bt, N_pad // Nt)
    out = pl.pallas_call(
        make_kernel(num_heads, N, N_pad),
        out_shape=jax.ShapeDtypeStruct((B_pad, C_pad), jnp.float32),
        grid=grid,
        in_specs=in_specs,
        out_specs=out_spec,
        scratch_shapes=[pltpu.VMEM((Bt, H), jnp.float32),    # running per-head max
                        pltpu.VMEM((Bt, H), jnp.float32),    # running per-head denom
                        pltpu.VMEM((Bt, D), jnp.float32)],   # running weighted values
        compiler_params=pltpu.CompilerParams(
            dimension_semantics=("parallel", "arbitrary"),
            vmem_limit_bytes=int(vmem_cap)),
    )(patch_p, cls_p, *weights)
    return out[:B, :C]


def init_params(key, D, num_heads, mlp_ratio, num_classes):
    HID = int(D * mlp_ratio)
    ks = jax.random.split(key, 7)
    std = 0.02

    def tn(k, shape):
        return std * jax.random.truncated_normal(k, -2.0, 2.0, shape, jnp.float32)

    return {
        "q0": tn(ks[0], (1, D)),                      # query_tokens (1, 1, D) -> (1, D)
        "g1": jnp.ones((1, D), jnp.float32),          # norm1 weight
        "b1": jnp.zeros((1, D), jnp.float32),         # norm1 bias
        "wq": tn(ks[1], (D, D)),                      # q linear (in, out)
        "bq": jnp.zeros((1, D), jnp.float32),
        "wkv": tn(ks[2], (D, 2 * D)),                 # kv linear (in, 2*out)
        "bkv": jnp.zeros((1, 2 * D), jnp.float32),
        "wp": tn(ks[3], (D, D)) / math.sqrt(2.0),     # proj, rescaled (layer_id=1)
        "bp": jnp.zeros((1, D), jnp.float32),
        "g2": jnp.ones((1, D), jnp.float32),          # norm2 weight
        "b2": jnp.zeros((1, D), jnp.float32),         # norm2 bias
        "wfc1": tn(ks[4], (D, HID)),
        "bfc1": jnp.zeros((1, HID), jnp.float32),
        "wfc2": tn(ks[5], (HID, D)) / math.sqrt(2.0), # fc2, rescaled (layer_id=1)
        "bfc2": jnp.zeros((1, D), jnp.float32),
        "wlin": tn(ks[6], (2 * D, num_classes)),      # classifier head
        "blin": jnp.zeros((1, num_classes), jnp.float32),
    }


def reference(patch_tokens, class_token, params, num_heads):
    """Pure-JAX f32 reference mirroring the PyTorch forward."""
    B, N, D = patch_tokens.shape
    hd = D // num_heads

    def ln(x, g, b):
        mu = x.mean(-1, keepdims=True)
        var = ((x - mu) ** 2).mean(-1, keepdims=True)
        return (x - mu) / jnp.sqrt(var + EPS) * g + b

    xn = ln(patch_tokens, params["g1"][0], params["b1"][0])
    q0 = jnp.broadcast_to(params["q0"][None], (B, 1, D))
    qp = q0 @ params["wq"] + params["bq"][0]
    kv = xn @ params["wkv"] + params["bkv"][0]
    k, v = kv[..., :D], kv[..., D:]
    qh = qp.reshape(B, 1, num_heads, hd).transpose(0, 2, 1, 3)
    kh = k.reshape(B, N, num_heads, hd).transpose(0, 2, 1, 3)
    vh = v.reshape(B, N, num_heads, hd).transpose(0, 2, 1, 3)
    attn = jax.nn.softmax((qh / math.sqrt(hd)) @ kh.transpose(0, 1, 3, 2), axis=-1)
    o = (attn @ vh).transpose(0, 2, 1, 3).reshape(B, 1, D)
    o = o @ params["wp"] + params["bp"][0]
    q1 = q0 + o
    q1n = ln(q1, params["g2"][0], params["b2"][0])
    h1 = jax.nn.gelu(q1n @ params["wfc1"] + params["bfc1"][0], approximate=False)
    h2 = h1 @ params["wfc2"] + params["bfc2"][0]
    pooled = (q1 + h2)[:, 0, :]
    comb = jnp.concatenate([pooled, class_token], axis=-1)
    return comb @ params["wlin"] + params["blin"][0]


if __name__ == "__main__":
    # Small shapes consistent with the module: embed_dim=32, num_heads=4, mlp_ratio=4,
    # num_classes=16, batch=2, num patch tokens=8.
    B, N, D = 2, 8, 32
    num_heads, mlp_ratio, num_classes = 4, 4.0, 16

    key = jax.random.PRNGKey(0)
    kp, kx, kc = jax.random.split(key, 3)
    params = init_params(kp, D, num_heads, mlp_ratio, num_classes)
    patch_tokens = jax.random.normal(kx, (B, N, D), dtype=jnp.float32)
    class_token = jax.random.normal(kc, (B, D), dtype=jnp.float32)

    out = attentive_classifier_forward(patch_tokens, class_token, params, num_heads)
    out = jax.block_until_ready(out)
    assert out.shape == (B, num_classes)

    ref = reference(patch_tokens, class_token, params, num_heads)
    if not np.allclose(np.asarray(out), np.asarray(ref), rtol=1e-2, atol=1e-2):
        raise AssertionError(
            f"kernel/reference mismatch; max abs err = "
            f"{np.max(np.abs(np.asarray(out) - np.asarray(ref)))}")

    print("KERNEL_OK")
</pallas_src>

<mosaic_0001>
module attributes {stable_mosaic.version = 11 : i64} {
  func.func @kernel(%arg0: i32, %arg1: i32, %arg2: memref<8x8x32xbf16, #tpu.memory_space<vmem>>, %arg3: memref<8x32xbf16, #tpu.memory_space<vmem>>, %arg4: memref<1x32xf32, #tpu.memory_space<vmem>>, %arg5: memref<1x32xf32, #tpu.memory_space<vmem>>, %arg6: memref<1x32xf32, #tpu.memory_space<vmem>>, %arg7: memref<32x32xbf16, #tpu.memory_space<vmem>>, %arg8: memref<1x32xf32, #tpu.memory_space<vmem>>, %arg9: memref<32x32xbf16, #tpu.memory_space<vmem>>, %arg10: memref<1x32xf32, #tpu.memory_space<vmem>>, %arg11: memref<32x4xf32, #tpu.memory_space<vmem>>, %arg12: memref<4x32xf32, #tpu.memory_space<vmem>>, %arg13: memref<32x32xbf16, #tpu.memory_space<vmem>>, %arg14: memref<1x32xf32, #tpu.memory_space<vmem>>, %arg15: memref<1x32xf32, #tpu.memory_space<vmem>>, %arg16: memref<1x32xf32, #tpu.memory_space<vmem>>, %arg17: memref<32x128xbf16, #tpu.memory_space<vmem>>, %arg18: memref<1x128xf32, #tpu.memory_space<vmem>>, %arg19: memref<128x32xbf16, #tpu.memory_space<vmem>>, %arg20: memref<1x32xf32, #tpu.memory_space<vmem>>, %arg21: memref<32x128xbf16, #tpu.memory_space<vmem>>, %arg22: memref<32x128xbf16, #tpu.memory_space<vmem>>, %arg23: memref<1x128xf32, #tpu.memory_space<vmem>>, %arg24: memref<8x128xf32, #tpu.memory_space<vmem>>, %arg25: memref<8x4xf32, #tpu.memory_space<vmem>>, %arg26: memref<8x4xf32, #tpu.memory_space<vmem>>, %arg27: memref<8x32xf32, #tpu.memory_space<vmem>>) attributes {dimension_semantics = [#tpu.dimension_semantics<parallel>, #tpu.dimension_semantics<arbitrary>], iteration_bounds = array<i64: 1, 1>, scalar_prefetch = 0 : i64, scratch_operands = 3 : i64, tpu.core_type = #tpu.core_type<tc>, window_params = [{transform_indices = @transform_0, window_bounds = array<i64: 8, 8, 32>}, {transform_indices = @transform_1, window_bounds = array<i64: 8, 32>}, {pipeline_mode = #tpu.pipeline_mode<synchronous>, transform_indices = @transform_2, window_bounds = array<i64: 1, 32>}, {pipeline_mode = #tpu.pipeline_mode<synchronous>, transform_indices = @transform_3, window_bounds = array<i64: 1, 32>}, {pipeline_mode = #tpu.pipeline_mode<synchronous>, transform_indices = @transform_4, window_bounds = array<i64: 1, 32>}, {pipeline_mode = #tpu.pipeline_mode<synchronous>, transform_indices = @transform_5, window_bounds = array<i64: 32, 32>}, {pipeline_mode = #tpu.pipeline_mode<synchronous>, transform_indices = @transform_6, window_bounds = array<i64: 1, 32>}, {pipeline_mode = #tpu.pipeline_mode<synchronous>, transform_indices = @transform_7, window_bounds = array<i64: 32, 32>}, {pipeline_mode = #tpu.pipeline_mode<synchronous>, transform_indices = @transform_8, window_bounds = array<i64: 1, 32>}, {pipeline_mode = #tpu.pipeline_mode<synchronous>, transform_indices = @transform_9, window_bounds = array<i64: 32, 4>}, {pipeline_mode = #tpu.pipeline_mode<synchronous>, transform_indices = @transform_10, window_bounds = array<i64: 4, 32>}, {pipeline_mode = #tpu.pipeline_mode<synchronous>, transform_indices = @transform_11, window_bounds = array<i64: 32, 32>}, {pipeline_mode = #tpu.pipeline_mode<synchronous>, transform_indices = @transform_12, window_bounds = array<i64: 1, 32>}, {pipeline_mode = #tpu.pipeline_mode<synchronous>, transform_indices = @transform_13, window_bounds = array<i64: 1, 32>}, {pipeline_mode = #tpu.pipeline_mode<synchronous>, transform_indices = @transform_14, window_bounds = array<i64: 1, 32>}, {pipeline_mode = #tpu.pipeline_mode<synchronous>, transform_indices = @transform_15, window_bounds = array<i64: 32, 128>}, {pipeline_mode = #tpu.pipeline_mode<synchronous>, transform_indices = @transform_16, window_bounds = array<i64: 1, 128>}, {pipeline_mode = #tpu.pipeline_mode<synchronous>, transform_indices = @transform_17, window_bounds = array<i64: 128, 32>}, {pipeline_mode = #tpu.pipeline_mode<synchronous>, transform_indices = @transform_18, window_bounds = array<i64: 1, 32>}, {pipeline_mode = #tpu.pipeline_mode<synchronous>, transform_indices = @transform_19, window_bounds = array<i64: 32, 128>}, {pipeline_mode = #tpu.pipeline_mode<synchronous>, transform_indices = @transform_20, window_bounds = array<i64: 32, 128>}, {pipeline_mode = #tpu.pipeline_mode<synchronous>, transform_indices = @transform_21, window_bounds = array<i64: 1, 128>}, {transform_indices = @transform_22, window_bounds = array<i64: 8, 128>}]} {
    %c0_i32 = arith.constant 0 : i32
    %0 = arith.cmpi eq, %arg1, %c0_i32 : i32
    %1 = arith.extui %0 : i1 to i32
    %c0_i32_0 = arith.constant 0 : i32
    %2 = arith.cmpi ne, %1, %c0_i32_0 : i32
    scf.if %2 {
      %cst_47 = arith.constant -1.000000e+30 : f32
      %76 = vector.broadcast %cst_47 : f32 to vector<8x4xf32>
      %c0_48 = arith.constant 0 : index
      %c0_49 = arith.constant 0 : index
      %77 = vector.load %arg25[%c0_48, %c0_49] : memref<8x4xf32, #tpu.memory_space<vmem>>, vector<8x4xf32>
      tpu.vector_store %arg25[%c0_48, %c0_49], %76 {strides = array<i32>} : memref<8x4xf32, #tpu.memory_space<vmem>>, vector<8x4xf32>,
      %cst_50 = arith.constant 0.000000e+00 : f32
      %78 = vector.broadcast %cst_50 : f32 to vector<8x4xf32>
      %c0_51 = arith.constant 0 : index
      %c0_52 = arith.constant 0 : index
      %79 = vector.load %arg26[%c0_51, %c0_52] : memref<8x4xf32, #tpu.memory_space<vmem>>, vector<8x4xf32>
      tpu.vector_store %arg26[%c0_51, %c0_52], %78 {strides = array<i32>} : memref<8x4xf32, #tpu.memory_space<vmem>>, vector<8x4xf32>,
      %cst_53 = arith.constant 0.000000e+00 : f32
      %80 = vector.broadcast %cst_53 : f32 to vector<8x32xf32>
      %c0_54 = arith.constant 0 : index
      %c0_55 = arith.constant 0 : index
      %81 = vector.load %arg27[%c0_54, %c0_55] : memref<8x32xf32, #tpu.memory_space<vmem>>, vector<8x32xf32>
      tpu.vector_store %arg27[%c0_54, %c0_55], %80 {strides = array<i32>} : memref<8x32xf32, #tpu.memory_space<vmem>>, vector<8x32xf32>,
    } else {
    }
    %c0 = arith.constant 0 : index
    %c0_1 = arith.constant 0 : index
    %c0_2 = arith.constant 0 : index
    %3 = vector.load %arg2[%c0, %c0_1, %c0_2] : memref<8x8x32xbf16, #tpu.memory_space<vmem>>, vector<8x8x32xbf16>
    %4 = arith.extf %3 : vector<8x8x32xbf16> to vector<8x8x32xf32>
    %c0_3 = arith.constant 0 : index
    %c0_4 = arith.constant 0 : index
    %5 = vector.load %arg5[%c0_3, %c0_4] : memref<1x32xf32, #tpu.memory_space<vmem>>, vector<1x32xf32>
    %c0_5 = arith.constant 0 : index
    %c0_6 = arith.constant 0 : index
    %6 = vector.load %arg6[%c0_5, %c0_6] : memref<1x32xf32, #tpu.memory_space<vmem>>, vector<1x32xf32>
    %cst = arith.constant dense<0.000000e+00> : vector<8x8xf32>
    %7 = vector.multi_reduction <add>, %4, %cst [2] : vector<8x8x32xf32> to vector<8x8xf32>
    %8 = vector.shape_cast %7 : vector<8x8xf32> to vector<8x8x1xf32>
    %cst_7 = arith.constant 3.200000e+01 : f32
    %9 = vector.broadcast %cst_7 : f32 to vector<8x8x1xf32>
    %10 = arith.divf %8, %9 : vector<8x8x1xf32>
    %11 = vector.broadcast %10 : vector<8x8x1xf32> to vector<8x8x32xf32>
    %12 = arith.subf %4, %11 : vector<8x8x32xf32>
    %13 = arith.mulf %12, %12 : vector<8x8x32xf32>
    %cst_8 = arith.constant dense<0.000000e+00> : vector<8x8xf32>
    %14 = vector.multi_reduction <add>, %13, %cst_8 [2] : vector<8x8x32xf32> to vector<8x8xf32>
    %15 = vector.shape_cast %14 : vector<8x8xf32> to vector<8x8x1xf32>
    %cst_9 = arith.constant 3.200000e+01 : f32
    %16 = vector.broadcast %cst_9 : f32 to vector<8x8x1xf32>
    %17 = arith.divf %15, %16 : vector<8x8x1xf32>
    %18 = vector.broadcast %10 : vector<8x8x1xf32> to vector<8x8x32xf32>
    %19 = arith.subf %4, %18 : vector<8x8x32xf32>
    %cst_10 = arith.constant 9.99999974E-6 : f32
    %20 = vector.broadcast %cst_10 : f32 to vector<8x8x1xf32>
    %21 = arith.addf %17, %20 : vector<8x8x1xf32>
    %22 = math.rsqrt %21 : vector<8x8x1xf32>
    %23 = vector.broadcast %22 : vector<8x8x1xf32> to vector<8x8x32xf32>
    %24 = arith.mulf %19, %23 : vector<8x8x32xf32>
    %25 = vector.shape_cast %5 : vector<1x32xf32> to vector<1x1x32xf32>
    %26 = vector.broadcast %25 : vector<1x1x32xf32> to vector<8x8x32xf32>
    %27 = arith.mulf %24, %26 : vector<8x8x32xf32>
    %28 = vector.shape_cast %6 : vector<1x32xf32> to vector<1x1x32xf32>
    %29 = vector.broadcast %28 : vector<1x1x32xf32> to vector<8x8x32xf32>
    %30 = arith.addf %27, %29 : vector<8x8x32xf32>
    %31 = vector.shape_cast %30 : vector<8x8x32xf32> to vector<64x32xf32>
    %32 = arith.truncf %31 : vector<64x32xf32> to vector<64x32xbf16>
    %c0_11 = arith.constant 0 : index
    %c0_12 = arith.constant 0 : index
    %33 = vector.load %arg7[%c0_11, %c0_12] : memref<32x32xbf16, #tpu.memory_space<vmem>>, vector<32x32xbf16>
    %cst_13 = arith.constant dense<0.000000e+00> : vector<64x32xf32>
    %34 = tpu.matmul %32, %33, %cst_13 {dimension_numbers = #tpu.dot_dimension_numbers<[1], [0], [0], [1], [0, 0, 1, 1], [], []>} : vector<64x32xbf16>, vector<32x32xbf16>, vector<64x32xf32> -> vector<64x32xf32>
    %c0_14 = arith.constant 0 : index
    %c0_15 = arith.constant 0 : index
    %35 = vector.load %arg8[%c0_14, %c0_15] : memref<1x32xf32, #tpu.memory_space<vmem>>, vector<1x32xf32>
    %36 = vector.broadcast %35 : vector<1x32xf32> to vector<64x32xf32>
    %37 = arith.addf %34, %36 : vector<64x32xf32>
    %c0_16 = arith.constant 0 : index
    %c0_17 = arith.constant 0 : index
    %38 = vector.load %arg11[%c0_16, %c0_17] : memref<32x4xf32, #tpu.memory_space<vmem>>, vector<32x4xf32>
    %cst_18 = arith.constant dense<0.000000e+00> : vector<64x4xf32>
    %39 = tpu.matmul %37, %38, %cst_18 {dimension_numbers = #tpu.dot_dimension_numbers<[1], [0], [0], [1], [0, 0, 1, 1], [], []>} : vector<64x32xf32>, vector<32x4xf32>, vector<64x4xf32> -> vector<64x4xf32>
    %40 = vector.shape_cast %39 : vector<64x4xf32> to vector<8x8x4xf32>
    %c0_19 = arith.constant 0 : index
    %c0_20 = arith.constant 0 : index
    %41 = vector.load %arg25[%c0_19, %c0_20] : memref<8x4xf32, #tpu.memory_space<vmem>>, vector<8x4xf32>
    %cst_21 = arith.constant dense<0xFF800000> : vector<8x4xf32>
    %42 = vector.multi_reduction <maximumf>, %40, %cst_21 [1] : vector<8x8x4xf32> to vector<8x4xf32>
    %43 = arith.maximumf %41, %42 : vector<8x4xf32>
    %44 = arith.subf %41, %43 : vector<8x4xf32>
    %45 = math.exp %44 : vector<8x4xf32>
    %46 = vector.shape_cast %43 : vector<8x4xf32> to vector<8x1x4xf32>
    %47 = vector.broadcast %46 : vector<8x1x4xf32> to vector<8x8x4xf32>
    %48 = arith.subf %40, %47 : vector<8x8x4xf32>
    %49 = math.exp %48 : vector<8x8x4xf32>
    %c0_22 = arith.constant 0 : index
    %c0_23 = arith.constant 0 : index
    %50 = vector.load %arg26[%c0_22, %c0_23] : memref<8x4xf32, #tpu.memory_space<vmem>>, vector<8x4xf32>
    %51 = arith.mulf %45, %50 : vector<8x4xf32>
    %cst_24 = arith.constant dense<0.000000e+00> : vector<8x4xf32>
    %52 = vector.multi_reduction <add>, %49, %cst_24 [1] : vector<8x8x4xf32> to vector<8x4xf32>
    %53 = arith.addf %51, %52 : vector<8x4xf32>
    %c0_25 = arith.constant 0 : index
    %c0_26 = arith.constant 0 : index
    %54 = vector.load %arg26[%c0_25, %c0_26] : memref<8x4xf32, #tpu.memory_space<vmem>>, vector<8x4xf32>
    tpu.vector_store %arg26[%c0_25, %c0_26], %53 {strides = array<i32>} : memref<8x4xf32, #tpu.memory_space<vmem>>, vector<8x4xf32>,
    %c0_27 = arith.constant 0 : index
    %c0_28 = arith.constant 0 : index
    %55 = vector.load %arg25[%c0_27, %c0_28] : memref<8x4xf32, #tpu.memory_space<vmem>>, vector<8x4xf32>
    tpu.vector_store %arg25[%c0_27, %c0_28], %43 {strides = array<i32>} : memref<8x4xf32, #tpu.memory_space<vmem>>, vector<8x4xf32>,
    %c0_29 = arith.constant 0 : index
    %c0_30 = arith.constant 0 : index
    %56 = vector.load %arg9[%c0_29, %c0_30] : memref<32x32xbf16, #tpu.memory_space<vmem>>, vector<32x32xbf16>
    %cst_31 = arith.constant dense<0.000000e+00> : vector<64x32xf32>
    %57 = tpu.matmul %32, %56, %cst_31 {dimension_numbers = #tpu.dot_dimension_numbers<[1], [0], [0], [1], [0, 0, 1, 1], [], []>} : vector<64x32xbf16>, vector<32x32xbf16>, vector<64x32xf32> -> vector<64x32xf32>
    %c0_32 = arith.constant 0 : index
    %c0_33 = arith.constant 0 : index
    %58 = vector.load %arg10[%c0_32, %c0_33] : memref<1x32xf32, #tpu.memory_space<vmem>>, vector<1x32xf32>
    %59 = vector.broadcast %58 : vector<1x32xf32> to vector<64x32xf32>
    %60 = arith.addf %57, %59 : vector<64x32xf32>
    %61 = vector.shape_cast %49 : vector<8x8x4xf32> to vector<64x4xf32>
    %c0_34 = arith.constant 0 : index
    %c0_35 = arith.constant 0 : index
    %62 = vector.load %arg12[%c0_34, %c0_35] : memref<4x32xf32, #tpu.memory_space<vmem>>, vector<4x32xf32>
    %cst_36 = arith.constant dense<0.000000e+00> : vector<64x32xf32>
    %63 = tpu.matmul %61, %62, %cst_36 {dimension_numbers = #tpu.dot_dimension_numbers<[1], [0], [0], [1], [0, 0, 1, 1], [], []>} : vector<64x4xf32>, vector<4x32xf32>, vector<64x32xf32> -> vector<64x32xf32>
    %64 = arith.mulf %63, %60 : vector<64x32xf32>
    %65 = vector.shape_cast %64 : vector<64x32xf32> to vector<8x8x32xf32>
    %cst_37 = arith.constant dense<0.000000e+00> : vector<8x32xf32>
    %66 = vector.multi_reduction <add>, %65, %cst_37 [1] : vector<8x8x32xf32> to vector<8x32xf32>
    %c0_38 = arith.constant 0 : index
    %c0_39 = arith.constant 0 : index
    %67 = vector.load %arg12[%c0_38, %c0_39] : memref<4x32xf32, #tpu.memory_space<vmem>>, vector<4x32xf32>
    %cst_40 = arith.constant dense<0.000000e+00> : vector<8x32xf32>
    %68 = tpu.matmul %45, %67, %cst_40 {dimension_numbers = #tpu.dot_dimension_numbers<[1], [0], [0], [1], [0, 0, 1, 1], [], []>} : vector<8x4xf32>, vector<4x32xf32>, vector<8x32xf32> -> vector<8x32xf32>
    %c0_41 = arith.constant 0 : index
    %c0_42 = arith.constant 0 : index
    %69 = vector.load %arg27[%c0_41, %c0_42] : memref<8x32xf32, #tpu.memory_space<vmem>>, vector<8x32xf32>
    %70 = arith.mulf %68, %69 : vector<8x32xf32>
    %71 = arith.addf %70, %66 : vector<8x32xf32>
    %c0_43 = arith.constant 0 : index
    %c0_44 = arith.constant 0 : index
    %72 = vector.load %arg27[%c0_43, %c0_44] : memref<8x32xf32, #tpu.memory_space<vmem>>, vector<8x32xf32>
    tpu.vector_store %arg27[%c0_43, %c0_44], %71 {strides = array<i32>} : memref<8x32xf32, #tpu.memory_space<vmem>>, vector<8x32xf32>,
    %c0_i32_45 = arith.constant 0 : i32
    %73 = arith.cmpi eq, %arg1, %c0_i32_45 : i32
    %74 = arith.extui %73 : i1 to i32
    %c0_i32_46 = arith.constant 0 : i32
    %75 = arith.cmpi ne, %74, %c0_i32_46 : i32
    scf.if %75 {
      %c0_47 = arith.constant 0 : index
      %c0_48 = arith.constant 0 : index
      %76 = vector.load %arg26[%c0_47, %c0_48] : memref<8x4xf32, #tpu.memory_space<vmem>>, vector<8x4xf32>
      %77 = tpu.reciprocal %76 {approx = true} : vector<8x4xf32> -> vector<8x4xf32>
      %c0_49 = arith.constant 0 : index
      %c0_50 = arith.constant 0 : index
      %78 = vector.load %arg12[%c0_49, %c0_50] : memref<4x32xf32, #tpu.memory_space<vmem>>, vector<4x32xf32>
      %cst_51 = arith.constant dense<0.000000e+00> : vector<8x32xf32>
      %79 = tpu.matmul %77, %78, %cst_51 {dimension_numbers = #tpu.dot_dimension_numbers<[1], [0], [0], [1], [0, 0, 1, 1], [], []>} : vector<8x4xf32>, vector<4x32xf32>, vector<8x32xf32> -> vector<8x32xf32>
      %c0_52 = arith.constant 0 : index
      %c0_53 = arith.constant 0 : index
      %80 = vector.load %arg27[%c0_52, %c0_53] : memref<8x32xf32, #tpu.memory_space<vmem>>, vector<8x32xf32>
      %81 = arith.mulf %80, %79 : vector<8x32xf32>
      %82 = arith.truncf %81 : vector<8x32xf32> to vector<8x32xbf16>
      %c0_54 = arith.constant 0 : index
      %c0_55 = arith.constant 0 : index
      %83 = vector.load %arg13[%c0_54, %c0_55] : memref<32x32xbf16, #tpu.memory_space<vmem>>, vector<32x32xbf16>
      %cst_56 = arith.constant dense<0.000000e+00> : vector<8x32xf32>
      %84 = tpu.matmul %82, %83, %cst_56 {dimension_numbers = #tpu.dot_dimension_numbers<[1], [0], [0], [1], [0, 0, 1, 1], [], []>} : vector<8x32xbf16>, vector<32x32xbf16>, vector<8x32xf32> -> vector<8x32xf32>
      %c0_57 = arith.constant 0 : index
      %c0_58 = arith.constant 0 : index
      %85 = vector.load %arg14[%c0_57, %c0_58] : memref<1x32xf32, #tpu.memory_space<vmem>>, vector<1x32xf32>
      %86 = vector.broadcast %85 : vector<1x32xf32> to vector<8x32xf32>
      %87 = arith.addf %84, %86 : vector<8x32xf32>
      %c0_59 = arith.constant 0 : index
      %c0_60 = arith.constant 0 : index
      %88 = vector.load %arg4[%c0_59, %c0_60] : memref<1x32xf32, #tpu.memory_space<vmem>>, vector<1x32xf32>
      %89 = vector.broadcast %88 : vector<1x32xf32> to vector<8x32xf32>
      %90 = arith.addf %89, %87 : vector<8x32xf32>
      %c0_61 = arith.constant 0 : index
      %c0_62 = arith.constant 0 : index
      %91 = vector.load %arg15[%c0_61, %c0_62] : memref<1x32xf32, #tpu.memory_space<vmem>>, vector<1x32xf32>
      %c0_63 = arith.constant 0 : index
      %c0_64 = arith.constant 0 : index
      %92 = vector.load %arg16[%c0_63, %c0_64] : memref<1x32xf32, #tpu.memory_space<vmem>>, vector<1x32xf32>
      %cst_65 = arith.constant dense<0.000000e+00> : vector<8xf32>
      %93 = vector.multi_reduction <add>, %90, %cst_65 [1] : vector<8x32xf32> to vector<8xf32>
      %94 = vector.shape_cast %93 : vector<8xf32> to vector<8x1xf32>
      %cst_66 = arith.constant 3.200000e+01 : f32
      %95 = vector.broadcast %cst_66 : f32 to vector<8x1xf32>
      %96 = arith.divf %94, %95 : vector<8x1xf32>
      %97 = vector.broadcast %96 : vector<8x1xf32> to vector<8x32xf32>
      %98 = arith.subf %90, %97 : vector<8x32xf32>
      %99 = arith.mulf %98, %98 : vector<8x32xf32>
      %cst_67 = arith.constant dense<0.000000e+00> : vector<8xf32>
      %100 = vector.multi_reduction <add>, %99, %cst_67 [1] : vector<8x32xf32> to vector<8xf32>
      %101 = vector.shape_cast %100 : vector<8xf32> to vector<8x1xf32>
      %cst_68 = arith.constant 3.200000e+01 : f32
      %102 = vector.broadcast %cst_68 : f32 to vector<8x1xf32>
      %103 = arith.divf %101, %102 : vector<8x1xf32>
      %104 = vector.broadcast %96 : vector<8x1xf32> to vector<8x32xf32>
      %105 = arith.subf %90, %104 : vector<8x32xf32>
      %cst_69 = arith.constant 9.99999974E-6 : f32
      %106 = vector.broadcast %cst_69 : f32 to vector<8x1xf32>
      %107 = arith.addf %103, %106 : vector<8x1xf32>
      %108 = math.rsqrt %107 : vector<8x1xf32>
      %109 = vector.broadcast %108 : vector<8x1xf32> to vector<8x32xf32>
      %110 = arith.mulf %105, %109 : vector<8x32xf32>
      %111 = vector.broadcast %91 : vector<1x32xf32> to vector<8x32xf32>
      %112 = arith.mulf %110, %111 : vector<8x32xf32>
      %113 = vector.broadcast %92 : vector<1x32xf32> to vector<8x32xf32>
      %114 = arith.addf %112, %113 : vector<8x32xf32>
      %115 = arith.truncf %114 : vector<8x32xf32> to vector<8x32xbf16>
      %c0_70 = arith.constant 0 : index
      %c0_71 = arith.constant 0 : index
      %116 = vector.load %arg17[%c0_70, %c0_71] : memref<32x128xbf16, #tpu.memory_space<vmem>>, vector<32x128xbf16>
      %cst_72 = arith.constant dense<0.000000e+00> : vector<8x128xf32>
      %117 = tpu.matmul %115, %116, %cst_72 {dimension_numbers = #tpu.dot_dimension_numbers<[1], [0], [0], [1], [0, 0, 1, 1], [], []>} : vector<8x32xbf16>, vector<32x128xbf16>, vector<8x128xf32> -> vector<8x128xf32>
      %c0_73 = arith.constant 0 : index
      %c0_74 = arith.constant 0 : index
      %118 = vector.load %arg18[%c0_73, %c0_74] : memref<1x128xf32, #tpu.memory_space<vmem>>, vector<1x128xf32>
      %119 = vector.broadcast %118 : vector<1x128xf32> to vector<8x128xf32>
      %120 = arith.addf %117, %119 : vector<8x128xf32>
      %cst_75 = arith.constant 5.000000e-01 : f32
      %121 = vector.broadcast %cst_75 : f32 to vector<8x128xf32>
      %122 = arith.mulf %121, %120 : vector<8x128xf32>
      %cst_76 = arith.constant 0.707106769 : f32
      %123 = vector.broadcast %cst_76 : f32 to vector<8x128xf32>
      %124 = arith.mulf %120, %123 : vector<8x128xf32>
      %cst_77 = arith.constant 0.000000e+00 : f32
      %125 = vector.broadcast %cst_77 : f32 to vector<8x128xf32>
      %126 = arith.cmpf oge, %124, %125 : vector<8x128xf32>
      %cst_78 = arith.constant 1.000000e+00 : f32
      %cst_79 = arith.constant -1.000000e+00 : f32
      %127 = vector.broadcast %cst_78 : f32 to vector<8x128xf32>
      %128 = vector.broadcast %cst_79 : f32 to vector<8x128xf32>
      %129 = arith.select %126, %127, %128 : vector<8x128xi1>, vector<8x128xf32>
      %130 = math.absf %124 : vector<8x128xf32>
      %cst_80 = arith.constant 0.327591091 : f32
      %131 = vector.broadcast %cst_80 : f32 to vector<8x128xf32>
      %132 = arith.mulf %131, %130 : vector<8x128xf32>
      %cst_81 = arith.constant 1.000000e+00 : f32
      %133 = vector.broadcast %cst_81 : f32 to vector<8x128xf32>
      %134 = arith.addf %133, %132 : vector<8x128xf32>
      %cst_82 = arith.constant 1.000000e+00 : f32
      %135 = vector.broadcast %cst_82 : f32 to vector<8x128xf32>
      %136 = arith.divf %135, %134 : vector<8x128xf32>
      %cst_83 = arith.constant 1.06140542 : f32
      %137 = vector.broadcast %cst_83 : f32 to vector<8x128xf32>
      %138 = arith.mulf %137, %136 : vector<8x128xf32>
      %cst_84 = arith.constant -1.45315206 : f32
      %139 = vector.broadcast %cst_84 : f32 to vector<8x128xf32>
      %140 = arith.addf %138, %139 : vector<8x128xf32>
      %141 = arith.mulf %140, %136 : vector<8x128xf32>
      %cst_85 = arith.constant 1.42141378 : f32
      %142 = vector.broadcast %cst_85 : f32 to vector<8x128xf32>
      %143 = arith.addf %141, %142 : vector<8x128xf32>
      %144 = arith.mulf %143, %136 : vector<8x128xf32>
      %cst_86 = arith.constant -0.284496725 : f32
      %145 = vector.broadcast %cst_86 : f32 to vector<8x128xf32>
      %146 = arith.addf %144, %145 : vector<8x128xf32>
      %147 = arith.mulf %146, %136 : vector<8x128xf32>
      %cst_87 = arith.constant 0.254829586 : f32
      %148 = vector.broadcast %cst_87 : f32 to vector<8x128xf32>
      %149 = arith.addf %147, %148 : vector<8x128xf32>
      %150 = arith.mulf %149, %136 : vector<8x128xf32>
      %cst_88 = arith.constant 0.000000e+00 : f32
      %151 = vector.broadcast %cst_88 : f32 to vector<8x128xf32>
      %152 = arith.subf %151, %130 : vector<8x128xf32>
      %153 = arith.mulf %152, %130 : vector<8x128xf32>
      %154 = math.exp %153 : vector<8x128xf32>
      %155 = arith.mulf %150, %154 : vector<8x128xf32>
      %cst_89 = arith.constant 1.000000e+00 : f32
      %156 = vector.broadcast %cst_89 : f32 to vector<8x128xf32>
      %157 = arith.subf %156, %155 : vector<8x128xf32>
      %158 = arith.mulf %129, %157 : vector<8x128xf32>
      %cst_90 = arith.constant 1.000000e+00 : f32
      %159 = vector.broadcast %cst_90 : f32 to vector<8x128xf32>
      %160 = arith.addf %159, %158 : vector<8x128xf32>
      %161 = arith.mulf %122, %160 : vector<8x128xf32>
      %162 = arith.truncf %161 : vector<8x128xf32> to vector<8x128xbf16>
      %c0_91 = arith.constant 0 : index
      %c0_92 = arith.constant 0 : index
      %163 = vector.load %arg19[%c0_91, %c0_92] : memref<128x32xbf16, #tpu.memory_space<vmem>>, vector<128x32xbf16>
      %cst_93 = arith.constant dense<0.000000e+00> : vector<8x32xf32>
      %164 = tpu.matmul %162, %163, %cst_93 {dimension_numbers = #tpu.dot_dimension_numbers<[1], [0], [0], [1], [0, 0, 1, 1], [], []>} : vector<8x128xbf16>, vector<128x32xbf16>, vector<8x32xf32> -> vector<8x32xf32>
      %c0_94 = arith.constant 0 : index
      %c0_95 = arith.constant 0 : index
      %165 = vector.load %arg20[%c0_94, %c0_95] : memref<1x32xf32, #tpu.memory_space<vmem>>, vector<1x32xf32>
      %166 = vector.broadcast %165 : vector<1x32xf32> to vector<8x32xf32>
      %167 = arith.addf %164, %166 : vector<8x32xf32>
      %168 = arith.addf %90, %167 : vector<8x32xf32>
      %169 = arith.truncf %168 : vector<8x32xf32> to vector<8x32xbf16>
      %c0_96 = arith.constant 0 : index
      %c0_97 = arith.constant 0 : index
      %170 = vector.load %arg21[%c0_96, %c0_97] : memref<32x128xbf16, #tpu.memory_space<vmem>>, vector<32x128xbf16>
      %cst_98 = arith.constant dense<0.000000e+00> : vector<8x128xf32>
      %171 = tpu.matmul %169, %170, %cst_98 {dimension_numbers = #tpu.dot_dimension_numbers<[1], [0], [0], [1], [0, 0, 1, 1], [], []>} : vector<8x32xbf16>, vector<32x128xbf16>, vector<8x128xf32> -> vector<8x128xf32>
      %c0_99 = arith.constant 0 : index
      %c0_100 = arith.constant 0 : index
      %172 = vector.load %arg3[%c0_99, %c0_100] : memref<8x32xbf16, #tpu.memory_space<vmem>>, vector<8x32xbf16>
      %c0_101 = arith.constant 0 : index
      %c0_102 = arith.constant 0 : index
      %173 = vector.load %arg22[%c0_101, %c0_102] : memref<32x128xbf16, #tpu.memory_space<vmem>>, vector<32x128xbf16>
      %cst_103 = arith.constant dense<0.000000e+00> : vector<8x128xf32>
      %174 = tpu.matmul %172, %173, %cst_103 {dimension_numbers = #tpu.dot_dimension_numbers<[1], [0], [0], [1], [0, 0, 1, 1], [], []>} : vector<8x32xbf16>, vector<32x128xbf16>, vector<8x128xf32> -> vector<8x128xf32>
      %175 = arith.addf %171, %174 : vector<8x128xf32>
      %c0_104 = arith.constant 0 : index
      %c0_105 = arith.constant 0 : index
      %176 = vector.load %arg23[%c0_104, %c0_105] : memref<1x128xf32, #tpu.memory_space<vmem>>, vector<1x128xf32>
      %177 = vector.broadcast %176 : vector<1x128xf32> to vector<8x128xf32>
      %178 = arith.addf %175, %177 : vector<8x128xf32>
      %c0_106 = arith.constant 0 : index
      %c0_107 = arith.constant 0 : index
      %179 = vector.load %arg24[%c0_106, %c0_107] : memref<8x128xf32, #tpu.memory_space<vmem>>, vector<8x128xf32>
      tpu.vector_store %arg24[%c0_106, %c0_107], %178 {strides = array<i32>} : memref<8x128xf32, #tpu.memory_space<vmem>>, vector<8x128xf32>,
    } else {
    }
    return
  }
  func.func @transform_0(%arg0: i32, %arg1: i32) -> (i32, i32, i32) {
    %c0_i32 = arith.constant 0 : i32
    %c0_i32_0 = arith.constant 0 : i32
    return %arg0, %arg1, %c0_i32 : i32, i32, i32
  }
  func.func @transform_1(%arg0: i32, %arg1: i32) -> (i32, i32) {
    %c0_i32 = arith.constant 0 : i32
    %c0_i32_0 = arith.constant 0 : i32
    return %arg0, %c0_i32 : i32, i32
  }
  func.func @transform_2(%arg0: i32, %arg1: i32) -> (i32, i32) {
    %c0_i32 = arith.constant 0 : i32
    %c0_i32_0 = arith.constant 0 : i32
    %c0_i32_1 = arith.constant 0 : i32
    return %c0_i32, %c0_i32_0 : i32, i32
  }
  func.func @transform_3(%arg0: i32, %arg1: i32) -> (i32, i32) {
    %c0_i32 = arith.constant 0 : i32
    %c0_i32_0 = arith.constant 0 : i32
    %c0_i32_1 = arith.constant 0 : i32
    return %c0_i32, %c0_i32_0 : i32, i32
  }
  func.func @transform_4(%arg0: i32, %arg1: i32) -> (i32, i32) {
    %c0_i32 = arith.constant 0 : i32
    %c0_i32_0 = arith.constant 0 : i32
    %c0_i32_1 = arith.constant 0 : i32
    return %c0_i32, %c0_i32_0 : i32, i32
  }
  func.func @transform_5(%arg0: i32, %arg1: i32) -> (i32, i32) {
    %c0_i32 = arith.constant 0 : i32
    %c0_i32_0 = arith.constant 0 : i32
    %c0_i32_1 = arith.constant 0 : i32
    return %c0_i32, %c0_i32_0 : i32, i32
  }
  func.func @transform_6(%arg0: i32, %arg1: i32) -> (i32, i32) {
    %c0_i32 = arith.constant 0 : i32
    %c0_i32_0 = arith.constant 0 : i32
    %c0_i32_1 = arith.constant 0 : i32
    return %c0_i32, %c0_i32_0 : i32, i32
  }
  func.func @transform_7(%arg0: i32, %arg1: i32) -> (i32, i32) {
    %c0_i32 = arith.constant 0 : i32
    %c0_i32_0 = arith.constant 0 : i32
    %c0_i32_1 = arith.constant 0 : i32
    return %c0_i32, %c0_i32_0 : i32, i32
  }
  func.func @transform_8(%arg0: i32, %arg1: i32) -> (i32, i32) {
    %c0_i32 = arith.constant 0 : i32
    %c0_i32_0 = arith.constant 0 : i32
    %c0_i32_1 = arith.constant 0 : i32
    return %c0_i32, %c0_i32_0 : i32, i32
  }
  func.func @transform_9(%arg0: i32, %arg1: i32) -> (i32, i32) {
    %c0_i32 = arith.constant 0 : i32
    %c0_i32_0 = arith.constant 0 : i32
    %c0_i32_1 = arith.constant 0 : i32
    return %c0_i32, %c0_i32_0 : i32, i32
  }
  func.func @transform_10(%arg0: i32, %arg1: i32) -> (i32, i32) {
    %c0_i32 = arith.constant 0 : i32
    %c0_i32_0 = arith.constant 0 : i32
    %c0_i32_1 = arith.constant 0 : i32
    return %c0_i32, %c0_i32_0 : i32, i32
  }
  func.func @transform_11(%arg0: i32, %arg1: i32) -> (i32, i32) {
    %c0_i32 = arith.constant 0 : i32
    %c0_i32_0 = arith.constant 0 : i32
    %c0_i32_1 = arith.constant 0 : i32
    return %c0_i32, %c0_i32_0 : i32, i32
  }
  func.func @transform_12(%arg0: i32, %arg1: i32) -> (i32, i32) {
    %c0_i32 = arith.constant 0 : i32
    %c0_i32_0 = arith.constant 0 : i32
    %c0_i32_1 = arith.constant 0 : i32
    return %c0_i32, %c0_i32_0 : i32, i32
  }
  func.func @transform_13(%arg0: i32, %arg1: i32) -> (i32, i32) {
    %c0_i32 = arith.constant 0 : i32
    %c0_i32_0 = arith.constant 0 : i32
    %c0_i32_1 = arith.constant 0 : i32
    return %c0_i32, %c0_i32_0 : i32, i32
  }
  func.func @transform_14(%arg0: i32, %arg1: i32) -> (i32, i32) {
    %c0_i32 = arith.constant 0 : i32
    %c0_i32_0 = arith.constant 0 : i32
    %c0_i32_1 = arith.constant 0 : i32
    return %c0_i32, %c0_i32_0 : i32, i32
  }
  func.func @transform_15(%arg0: i32, %arg1: i32) -> (i32, i32) {
    %c0_i32 = arith.constant 0 : i32
    %c0_i32_0 = arith.constant 0 : i32
    %c0_i32_1 = arith.constant 0 : i32
    return %c0_i32, %c0_i32_0 : i32, i32
  }
  func.func @transform_16(%arg0: i32, %arg1: i32) -> (i32, i32) {
    %c0_i32 = arith.constant 0 : i32
    %c0_i32_0 = arith.constant 0 : i32
    %c0_i32_1 = arith.constant 0 : i32
    return %c0_i32, %c0_i32_0 : i32, i32
  }
  func.func @transform_17(%arg0: i32, %arg1: i32) -> (i32, i32) {
    %c0_i32 = arith.constant 0 : i32
    %c0_i32_0 = arith.constant 0 : i32
    %c0_i32_1 = arith.constant 0 : i32
    return %c0_i32, %c0_i32_0 : i32, i32
  }
  func.func @transform_18(%arg0: i32, %arg1: i32) -> (i32, i32) {
    %c0_i32 = arith.constant 0 : i32
    %c0_i32_0 = arith.constant 0 : i32
    %c0_i32_1 = arith.constant 0 : i32
    return %c0_i32, %c0_i32_0 : i32, i32
  }
  func.func @transform_19(%arg0: i32, %arg1: i32) -> (i32, i32) {
    %c0_i32 = arith.constant 0 : i32
    %c0_i32_0 = arith.constant 0 : i32
    %c0_i32_1 = arith.constant 0 : i32
    return %c0_i32, %c0_i32_0 : i32, i32
  }
  func.func @transform_20(%arg0: i32, %arg1: i32) -> (i32, i32) {
    %c0_i32 = arith.constant 0 : i32
    %c0_i32_0 = arith.constant 0 : i32
    %c0_i32_1 = arith.constant 0 : i32
    return %c0_i32, %c0_i32_0 : i32, i32
  }
  func.func @transform_21(%arg0: i32, %arg1: i32) -> (i32, i32) {
    %c0_i32 = arith.constant 0 : i32
    %c0_i32_0 = arith.constant 0 : i32
    %c0_i32_1 = arith.constant 0 : i32
    return %c0_i32, %c0_i32_0 : i32, i32
  }
  func.func @transform_22(%arg0: i32, %arg1: i32) -> (i32, i32) {
    %c0_i32 = arith.constant 0 : i32
    %c0_i32_0 = arith.constant 0 : i32
    return %arg0, %c0_i32 : i32, i32
  }
}

</mosaic_0001>

<bundles_post_ra>
// kernel: tpu_custom_call.1
= control target key start
LH: loop header
LB: loop body
LE: loop exit
PB: predicated region body
PF: predicated region fallthrough
CT: control target
= control target key end

     0   :  { %s2247_s0 = inlined_call_operand.vmem [shape: bf16[8,8,32], index: 0, kind: input, shape index: {}]   ;;  %s2248_s1 = inlined_call_operand.vmem [shape: bf16[8,32], index: 1, kind: input, shape index: {}]   ;;  %s2249_s2 = inlined_call_operand.vmem [shape: f32[1,32], index: 2, kind: input, shape index: {}]   ;;  %s2250_s3 = inlined_call_operand.hbm [shape: f32[1,32], index: 3, kind: input, shape index: {}]   ;;  %s2251_s4 = inlined_call_operand.hbm [shape: f32[1,32], index: 4, kind: input, shape index: {}]   ;;  %s2252_s5 = inlined_call_operand.vmem [shape: bf16[32,32], index: 5, kind: input, shape index: {}]   ;;  %s2253_s6 = inlined_call_operand.hbm [shape: f32[1,32], index: 6, kind: input, shape index: {}]   ;;  %s2254_s7 = inlined_call_operand.vmem [shape: bf16[32,32], index: 7, kind: input, shape index: {}]   ;;  %s2255_s8 = inlined_call_operand.hbm [shape: f32[1,32], index: 8, kind: input, shape index: {}]   ;;  %s2256_s9 = inlined_call_operand.vmem [shape: f32[32,4], index: 9, kind: input, shape index: {}]   ;;  %s2257_s10 = inlined_call_operand.vmem [shape: f32[4,32], index: 10, kind: input, shape index: {}]   ;;  %s2258_s11 = inlined_call_operand.vmem [shape: bf16[32,32], index: 11, kind: input, shape index: {}]   ;;  %s2259_s12 = inlined_call_operand.vmem [shape: f32[1,32], index: 12, kind: input, shape index: {}]   ;;  %s2260_s13 = inlined_call_operand.vmem [shape: f32[1,32], index: 13, kind: input, shape index: {}]   ;;  %s2261_s14 = inlined_call_operand.vmem [shape: f32[1,32], index: 14, kind: input, shape index: {}]   ;;  %s2262_s15 = inlined_call_operand.vmem [shape: bf16[32,128], index: 15, kind: input, shape index: {}]   ;;  %s2263_s16 = inlined_call_operand.vmem [shape: f32[1,128], index: 16, kind: input, shape index: {}]   ;;  %s2264_s17 = inlined_call_operand.vmem [shape: bf16[128,32], index: 17, kind: input, shape index: {}]   ;;  %s2265_s18 = inlined_call_operand.vmem [shape: f32[1,32], index: 18, kind: input, shape index: {}]   ;;  %s2266_s19 = inlined_call_operand.hbm [shape: bf16[32,128], index: 19, kind: input, shape index: {}]   ;;  %s2267_s20 = inlined_call_operand.hbm [shape: bf16[32,128], index: 20, kind: input, shape index: {}]   ;;  %s2268_s21 = inlined_call_operand.vmem [shape: f32[1,128], index: 21, kind: input, shape index: {}]   ;;  %s2269_s22 = inlined_call_operand.hbm [shape: f32[8,128], index: 22, kind: output, shape index: {}]  }
   0x1   :  { %2272 = sst [smem:[#allocation22_spill]] %s2247_s0 }
   0x2   :  { %2273 = sst [smem:[#allocation23_spill]] %s2248_s1 }
   0x3   :  { %2274 = sst [smem:[#allocation24_spill]] %s2249_s2 }
   0x4   :  { %2275 = sst [smem:[#allocation25_spill]] %s2250_s3 }
   0x5   :  { %2276 = sst [smem:[#allocation26_spill]] %s2251_s4 }
   0x6   :  { %2277 = sst [smem:[#allocation27_spill]] %s2252_s5 }
   0x7   :  { %2278 = sst [smem:[#allocation28_spill]] %s2253_s6 }
   0x8   :  { %2279 = sst [smem:[#allocation29_spill]] %s2268_s21 }
   0x9   :  { %2280 = sst [smem:[#allocation30_spill]] %s2269_s22 }
   0xa   :  { %27 = vsyncpa [#allocation6], 0 }
   0xb   :  { %28 = vsyncpa [#allocation9], 0 }
   0xc   :  { %29 = vsyncpa [#allocation12], 0 }
   0xd   :  { %30 = vsyncpa [#allocation15], 0  ;;  %s2281_s29 = sld [smem:[#allocation26_spill]] }
  0x13   :  { %s54_s30 = sshll.u32 %s2281_s29, 4  ;;  %s55_s30 = int_to_ptr.hbm [resolvable:$true] %s54_s30 }
  0x14   :  { %31 = vsyncpa [#allocation7], 0  ;;  %s1724_s4 = smov [#allocation8]   ;;  %s80_s5 = sshll.u32 %s2255_s8, 4  ;;  %s81_s5 = int_to_ptr.hbm [resolvable:$true] %s80_s5 }
  0x15   :  { %s56_s0 = sshll.u32 %s1724_s4, 4  ;;  %s1725_s24 = smov [#allocation11]   ;;  %s57_s0 = int_to_ptr.vmem [resolvable:$true] %s56_s0 }
  0x16   :  { %59 = dma.hbm_to_vmem [thread:$0]  %s55_s30, 16, %s57_s0, [#allocation9]  }
  0x17   :  { %s82_s6 = sshll.u32 %s1725_s24, 4  ;;  %s2282_s2 = sld [smem:[#allocation25_spill]]  ;;  %s83_s6 = int_to_ptr.vmem [resolvable:$true] %s82_s6 }
  0x18   :  { %85 = dma.hbm_to_vmem [thread:$0]  %s81_s5, 16, %s83_s6, [#allocation12]  }
  0x19   :  { %s2283_s29 = sld [smem:[#allocation28_spill]]  ;;  %s1726_s22 = smov [#allocation5]  }
  0x1a   :  { %s45_s21 = sshll.u32 %s1726_s22, 4  ;;  %s1727_s8 = smov [#allocation10]   ;;  %s46_s21 = int_to_ptr.vmem [resolvable:$true] %s45_s21 }
  0x1b   :  { %s69_s30 = sshll.u32 %s1727_s8, 4  ;;  %s110_s1 = sshll.u32 %s2266_s19, 4  ;;  %s70_s30 = int_to_ptr.vmem [resolvable:$true] %s69_s30  ;;  %s111_s1 = int_to_ptr.hbm [resolvable:$true] %s110_s1 }
  0x1c   :  { %s1728_s24 = smov [#allocation13]   ;;  %s123_s26 = sshll.u32 %s2267_s20, 4  ;;  %s124_s26 = int_to_ptr.hbm [resolvable:$true] %s123_s26 }
  0x1d   :  { %s43_s27 = sshll.u32 %s2282_s2, 4  ;;  %s112_s5 = sshll.u32 %s1728_s24, 4  ;;  %s44_s27 = int_to_ptr.hbm [resolvable:$true] %s43_s27  ;;  %s113_s5 = int_to_ptr.vmem [resolvable:$true] %s112_s5 }
  0x1e   :  { %48 = dma.hbm_to_vmem [thread:$0]  %s44_s27, 16, %s46_s21, [#allocation6]  }
  0x1f   :  { %s67_s4 = sshll.u32 %s2283_s29, 4  ;;  %s1729_s22 = smov 64   ;;  %s68_s4 = int_to_ptr.hbm [resolvable:$true] %s67_s4 }
  0x20   :  { %72 = dma.hbm_to_vmem [thread:$0]  %s68_s4, 16, %s70_s30, [#allocation9]  }
  0x21   :  { %s1730_s2 = smov 4   ;;  %s1731_s21 = smov [#allocation14]  }
  0x22   :  { %118 = dma.hbm_to_vmem [thread:$0]  %s111_s1, 256, %s113_s5, [#allocation12], %s1729_s22, %s1729_s22, %s1730_s2  }
  0x23   :  { %s125_s27 = sshll.u32 %s1731_s21, 4  ;;  %s126_s27 = int_to_ptr.vmem [resolvable:$true] %s125_s27 }
  0x24   :  { %131 = dma.hbm_to_vmem [thread:$0]  %s124_s26, 256, %s126_s27, [#allocation15], %s1729_s22, %s1729_s22, %s1730_s2  }
  0x25   :  { %1714 = dma.done.wait [#allocation6], 16  }
  0x26   :  { %1715 = vsyncadd [#allocation6], 4294967280 }
  0x27   :  { %1716 = dma.done.wait [#allocation9], 32  }
  0x28   :  { %1717 = vsyncadd [#allocation9], 4294967264 }
  0x29   :  { %1718 = dma.done.wait [#allocation12], 272  }
  0x2a   :  { %1719 = vsyncadd [#allocation12], 4294967024 }
  0x2b   :  { %1720 = dma.done.wait [#allocation15], 256  }
  0x2c   :  { %1721 = vsyncadd [#allocation15], 4294967040  ;;  %vm166_vm0 = vcmask 261120   ;;  %s2284_s20 = sld [smem:[#allocation22_spill]]  ;;  %v1732_v18 = vmov 32.0   ;;  %v1438_v63 = vld [vmem:[%s2254_s7 + $0x8] sm:$0xff] }
  0x2d   :  { %1502 = vrcp.f32 %v1732_v18  ;;  %s2285_s24 = sld [smem:[#allocation27_spill]]  ;;  %762 = vmatpush.bf16.msra.mxu2 %v1438_v63 }
  0x2e   :  { %s2286_s25 = sld [smem:[#allocation24_spill]] }
  0x2f   :  { %s2288_s2 = sld [smem:[#allocation29_spill]] }
  0x30   :  { %s2289_s19 = sld [smem:[#allocation30_spill]] }
  0x32   :  { %v1873_v0 = vld [vmem:[%s2284_s20 + $0x10] sm:$0xff]   ;;  %v1471_v1 = vld [vmem:[%s2284_s20 + $0x8] sm:$0xff]   ;;  %v1456_v2 = vld [vmem:[%s2284_s20] sm:$0xff]  }
  0x33   :  { %v1465_v3 = vunpack.c.l.bf16 %v1873_v0  ;;  %v1461_v4 = vunpack.c.l.bf16 %v1471_v1  ;;  %v1457_v5 = vunpack.c.l.bf16 %v1456_v2  ;;  %v1466_v9 = vunpack.c.h.bf16 %v1873_v0  ;;  %v1892_v15 = vld [vmem:[%s2284_s20 + $0x18] sm:$0xff]   ;;  %v1503_v19 = vpop.eup %1502  ;;  %v1436_v62 = vld [vmem:[%s2285_s24 + $0x8] sm:$0xff] }
  0x34   :  { %v1462_v10 = vunpack.c.h.bf16 %v1471_v1  ;;  %v1458_v11 = vunpack.c.h.bf16 %v1456_v2  ;;  %v1469_v16 = vunpack.c.l.bf16 %v1892_v15  ;;  %v212_v20 = vmul.f32 32.0, %v1503_v19  ;;  %434 = vmatpush.bf16.msra.mxu0 %v1436_v62 }
  0x35   :  { %v199_v6 = vsel %vm166_vm0, %v1465_v3, 0.0  ;;  %v193_v7 = vsel %vm166_vm0, %v1461_v4, 0.0  ;;  %v187_v8 = vsel %vm166_vm0, %v1457_v5, 0.0  ;;  %v202_v12 = vsel %vm166_vm0, %v1466_v9, 0.0 }
  0x36   :  { %200 = vadd.xlane.f32.xlu2 %v199_v6  ;;  %194 = vadd.xlane.f32.xlu1 %v193_v7  ;;  %v196_v13 = vsel %vm166_vm0, %v1462_v10, 0.0  ;;  %v190_v14 = vsel %vm166_vm0, %v1458_v11, 0.0  ;;  %v205_v17 = vsel %vm166_vm0, %v1469_v16, 0.0  ;;  %v213_v21 = vsub.f32 1.0, %v212_v20  ;;  %s1309_s3 = sshll.u32 %s2289_s19, 4  ;;  %s1310_s3 = int_to_ptr.hbm [resolvable:$true] %s1309_s3 }
  0x37   :  { %188 = vadd.xlane.f32.xlu0 %v187_v8  ;;  %vm216_vm1 = vweird.f32 %v1503_v19  ;;  %v1470_v39 = vunpack.c.h.bf16 %v1892_v15 }
  0x38   :  { %v214_v22 = vmul.f32 %v1503_v19, %v213_v21 }
  0x39   :  { %v208_v45 = vsel %vm166_vm0, %v1470_v39, 0.0 }
  0x3a   :  { %v215_v23 = vadd.f32 %v1503_v19, %v214_v22 }
  0x3c   :  { %v1896_v24 = vsel %vm216_vm1, %v1503_v19, %v215_v23 }
  0x3e   :  { %203 = vadd.xlane.f32.xlu2 %v202_v12  ;;  %197 = vadd.xlane.f32.xlu1 %v196_v13 }
  0x3f   :  { %191 = vadd.xlane.f32.xlu0 %v190_v14 }
  0x46   :  { %206 = vadd.xlane.f32.xlu2 %v205_v17 }
  0xa9   :  { %v201_v25 = vpop.xlane.xlu2 %200  ;;  %v195_v26 = vpop.xlane.xlu1 %194 }
  0xaa   :  { %v189_v27 = vpop.xlane.xlu0 %188  ;;  %v222_v36 = vmul.f32 %v1896_v24, %v201_v25  ;;  %v220_v37 = vmul.f32 %v1896_v24, %v195_v26 }
  0xab   :  { %v218_v28 = vmul.f32 %v1896_v24, %v189_v27 }
  0xac   :  { %v1915_v43 = vsub.f32 %v1465_v3, %v222_v36  ;;  %v1917_v44 = vsub.f32 %v1461_v4, %v220_v37  ;;  %v1435_v3 = vld [vmem:[%s2285_s24] sm:$0xff] }
  0xad   :  { %v1899_v29 = vsub.f32 %v1457_v5, %v218_v28  ;;  %v1437_v4 = vld [vmem:[%s2254_s7] sm:$0xff]  ;;  %435 = vmatpush.bf16.msra.mxu0 %v1435_v3  ;;  %s1736_s7 = smov [#allocation16]  }
  0xae   :  { %v238_v52 = vmul.f32 %v1915_v43, %v1915_v43  ;;  %v236_v53 = vmul.f32 %v1917_v44, %v1917_v44  ;;  %763 = vmatpush.bf16.msra.mxu2 %v1437_v4  ;;  %s1307_s21 = sshll.u32 %s1736_s7, 4  ;;  %s1308_s21 = int_to_ptr.vmem [resolvable:$true] %s1307_s21 }
  0xaf   :  { %v234_v30 = vmul.f32 %v1899_v29, %v1899_v29 }
  0xb0   :  { %v254_v57 = vsel %vm166_vm0, %v238_v52, 0.0  ;;  %v248_v58 = vsel %vm166_vm0, %v236_v53, 0.0 }
  0xb1   :  { %v204_v31 = vpop.xlane.xlu2 %203  ;;  %v198_v32 = vpop.xlane.xlu1 %197  ;;  %v242_v33 = vsel %vm166_vm0, %v234_v30, 0.0 }
  0xb2   :  { %v221_v34 = vmul.f32 %v1896_v24, %v198_v32  ;;  %243 = vadd.xlane.f32.xlu0 %v242_v33  ;;  %v192_v35 = vpop.xlane.xlu0 %191  ;;  %v223_v51 = vmul.f32 %v1896_v24, %v204_v31 }
  0xb3   :  { %v219_v38 = vmul.f32 %v1896_v24, %v192_v35 }
  0xb4   :  { %v1909_v40 = vsub.f32 %v1462_v10, %v221_v34  ;;  %v1934_v56 = vsub.f32 %v1466_v9, %v223_v51 }
  0xb5   :  { %v1911_v41 = vsub.f32 %v1458_v11, %v219_v38 }
  0xb6   :  { %v237_v42 = vmul.f32 %v1909_v40, %v1909_v40  ;;  %v239_v60 = vmul.f32 %v1934_v56, %v1934_v56 }
  0xb7   :  { %v235_v46 = vmul.f32 %v1911_v41, %v1911_v41 }
  0xb8   :  { %v251_v47 = vsel %vm166_vm0, %v237_v42, 0.0  ;;  %v257_v61 = vsel %vm166_vm0, %v239_v60, 0.0 }
  0xb9   :  { %v207_v48 = vpop.xlane.xlu2 %206  ;;  %252 = vadd.xlane.f32.xlu2 %v251_v47  ;;  %v245_v49 = vsel %vm166_vm0, %v235_v46, 0.0 }
  0xba   :  { %v224_v50 = vmul.f32 %v1896_v24, %v207_v48  ;;  %209 = vadd.xlane.f32.xlu0 %v208_v45  ;;  %246 = vadd.xlane.f32.xlu1 %v245_v49 }
  0xbc   :  { %v1930_v54 = vsub.f32 %v1469_v16, %v224_v50  ;;  %v1978_v50 = vld [vmem:[#allocation5] ss:$0 sm:$0xff] }
  0xbe   :  { %v240_v55 = vmul.f32 %v1930_v54, %v1930_v54 }
  0xc0   :  { %v260_v59 = vsel %vm166_vm0, %v240_v55, 0.0 }
  0xc1   :  { %261 = vadd.xlane.f32.xlu2 %v260_v59  ;;  %v1982_v59 = vld [vmem:[#allocation8] ss:$0 sm:$0xff] }
  0xc2   :  { %255 = vadd.xlane.f32.xlu0 %v254_v57  ;;  %249 = vadd.xlane.f32.xlu1 %v248_v58 }
  0xca   :  { %258 = vadd.xlane.f32.xlu1 %v257_v61 }
 0x125   :  { %v244_v0 = vpop.xlane.xlu0 %243 }
 0x126   :  { %v266_v1 = vmul.f32 %v244_v0, %v1896_v24 }
 0x128   :  { %v274_v2 = vadd.f32 1e-05, %v266_v1 }
 0x12a   :  { %1504 = vrsqrt.f32 %v274_v2  ;;  %vm288_vm3 = vweird.f32 %v274_v2 }
 0x12c   :  { %v253_v5 = vpop.xlane.xlu2 %252 }
 0x12d   :  { %v269_v6 = vmul.f32 %v253_v5, %v1896_v24  ;;  %v247_v7 = vpop.xlane.xlu1 %246  ;;  %v210_v8 = vpop.xlane.xlu0 %209 }
 0x12e   :  { %v267_v9 = vmul.f32 %v247_v7, %v1896_v24  ;;  %v225_v10 = vmul.f32 %v1896_v24, %v210_v8 }
 0x12f   :  { %v1958_v11 = vadd.f32 1e-05, %v269_v6 }
 0x130   :  { %v1505_v12 = vpop.eup %1504  ;;  %v275_v13 = vadd.f32 1e-05, %v267_v9  ;;  %v1960_v14 = vsub.f32 %v1470_v39, %v225_v10 }
 0x131   :  { %v283_v15 = vmul.f32 %v1505_v12, %v274_v2  ;;  %1506 = vrsqrt.f32 %v1958_v11  ;;  %vm289_vm2 = vweird.f32 %v1505_v12  ;;  %vm318_vm10 = vweird.f32 %v1958_v11 }
 0x132   :  { %1508 = vrsqrt.f32 %v275_v13  ;;  %v241_v16 = vmul.f32 %v1960_v14, %v1960_v14  ;;  %vm290_vm4 = vmor %vm288_vm3, %vm289_vm2  ;;  %vm298_vm5 = vweird.f32 %v275_v13 }
 0x133   :  { %v284_v17 = vmul.f32 %v1505_v12, %v283_v15 }
 0x134   :  { %v263_v18 = vsel %vm166_vm0, %v241_v16, 0.0 }
 0x135   :  { %v285_v19 = vmul.f32 0.5, %v284_v17  ;;  %v250_v20 = vpop.xlane.xlu1 %249  ;;  %264 = vadd.xlane.f32.xlu0 %v263_v18  ;;  %v256_v22 = vpop.xlane.xlu0 %255 }
 0x136   :  { %v268_v21 = vmul.f32 %v250_v20, %v1896_v24  ;;  %v270_v30 = vmul.f32 %v256_v22, %v1896_v24 }
 0x137   :  { %v1967_v23 = vpop.eup %1506  ;;  %v286_v25 = vsub.f32 1.5, %v285_v19 }
 0x138   :  { %v1509_v26 = vpop.eup %1508  ;;  %v276_v27 = vadd.f32 1e-05, %v268_v21  ;;  %v313_v32 = vmul.f32 %v1967_v23, %v1958_v11  ;;  %v1972_v35 = vadd.f32 1e-05, %v270_v30  ;;  %vm319_vm11 = vweird.f32 %v1967_v23 }
 0x139   :  { %v293_v28 = vmul.f32 %v1509_v26, %v275_v13  ;;  %v287_v31 = vmul.f32 %v1505_v12, %v286_v25  ;;  %vm299_vm6 = vweird.f32 %v1509_v26  ;;  %vm320_vm13 = vmor %vm318_vm10, %vm319_vm11  ;;  %vm163_vm11 = vcmask 31744  }
 0x13a   :  { %1510 = vrsqrt.f32 %v276_v27  ;;  %v314_v38 = vmul.f32 %v1967_v23, %v313_v32  ;;  %vm300_vm7 = vmor %vm298_vm5, %vm299_vm6  ;;  %vm308_vm8 = vweird.f32 %v276_v27  ;;  %vm328_vm1 = vweird.f32 %v1972_v35 }
 0x13b   :  { %v294_v33 = vmul.f32 %v1509_v26, %v293_v28  ;;  %v291_v37 = vsel %vm290_vm4, %v1505_v12, %v287_v31  ;;  %1512 = vrsqrt.f32 %v1972_v35 }
 0x13c   :  { %v362_v47 = vmul.f32 %v291_v37, %v1899_v29  ;;  %v315_v51 = vmul.f32 0.5, %v314_v38  ;;  %v459_v37 = vld [vmem:[%s2256_s9 + $0x10] sm:$0xff] }
 0x13d   :  { %v295_v34 = vmul.f32 0.5, %v294_v33  ;;  %v259_v36 = vpop.xlane.xlu1 %258  ;;  %v262_v33 = vpop.xlane.xlu2 %261 }
 0x13e   :  { %v271_v39 = vmul.f32 %v259_v36, %v1896_v24  ;;  %v373_v58 = vmul.f32 %v1978_v50, %v362_v47  ;;  %v316_v60 = vsub.f32 1.5, %v315_v51  ;;  %v457_v47 = vld [vmem:[%s2256_s9] sm:$0xff] }
 0x13f   :  { %v296_v42 = vsub.f32 1.5, %v295_v34  ;;  %v272_v34 = vmul.f32 %v262_v33, %v1896_v24 }
 0x140   :  { %v1511_v45 = vpop.eup %1510  ;;  %v279_v46 = vadd.f32 1e-05, %v271_v39  ;;  %v384_v1 = vadd.f32 %v1982_v59, %v373_v58  ;;  %v317_v2 = vmul.f32 %v1967_v23, %v316_v60 }
 0x141   :  { %v297_v48 = vmul.f32 %v1509_v26, %v296_v42  ;;  %v303_v49 = vmul.f32 %v1511_v45, %v276_v27  ;;  %vm309_vm9 = vweird.f32 %v1511_v45  ;;  %v1513_v61 = vpop.eup %1512 }
 0x142   :  { %1514 = vrsqrt.f32 %v279_v46  ;;  %vm310_vm12 = vmor %vm308_vm8, %vm309_vm9  ;;  %v323_v3 = vmul.f32 %v1513_v61, %v1972_v35  ;;  %v321_v8 = vsel %vm320_vm13, %v1967_v23, %v317_v2  ;;  %vm338_vm14 = vweird.f32 %v279_v46 }
 0x143   :  { %v301_v52 = vsel %vm300_vm7, %v1509_v26, %v297_v48  ;;  %v304_v53 = vmul.f32 %v1511_v45, %v303_v49  ;;  %v365_v12 = vmul.f32 %v321_v8, %v1909_v40  ;;  %vm329_vm2 = vweird.f32 %v1513_v61 }
 0x144   :  { %v363_v55 = vmul.f32 %v301_v52, %v1911_v41  ;;  %v324_v9 = vmul.f32 %v1513_v61, %v323_v3  ;;  %vm330_vm4 = vmor %vm328_vm1, %vm329_vm2  ;;  %v280_v35 = vadd.f32 1e-05, %v272_v34  ;;  %vm592_vm13 = vcmask 1041409  }
 0x145   :  { %v305_v57 = vmul.f32 0.5, %v304_v53  ;;  %v376_v17 = vmul.f32 %v1978_v50, %v365_v12  ;;  %vm598_vm1 = vcmask 1044484   ;;  %vm600_vm2 = vcmask 1045509  }
 0x146   :  { %v374_v29 = vmul.f32 %v1978_v50, %v363_v55  ;;  %v325_v13 = vmul.f32 0.5, %v324_v9  ;;  %1516 = vrsqrt.f32 %v280_v35  ;;  %vm348_vm5 = vweird.f32 %v280_v35 }
 0x147   :  { %v306_v62 = vsub.f32 1.5, %v305_v57 }
 0x148   :  { %v385_v63 = vadd.f32 %v1982_v59, %v374_v29  ;;  %v1515_v0 = vpop.eup %1514  ;;  %v326_v18 = vsub.f32 1.5, %v325_v13 }
 0x149   :  { %v307_v41 = vmul.f32 %v1511_v45, %v306_v62  ;;  %v333_v4 = vmul.f32 %v1515_v0, %v279_v46  ;;  %vm339_vm15 = vweird.f32 %v1515_v0 }
 0x14a   :  { %v392_v5 = vpack.c.bf16 %v385_v63, %v384_v1  ;;  %vm340_vm3 = vmor %vm338_vm14, %vm339_vm15  ;;  %v327_v21 = vmul.f32 %v1513_v61, %v326_v18  ;;  %vm594_vm14 = vcmask 1042434   ;;  %vm596_vm15 = vcmask 1043459  }
 0x14b   :  { %v311_v6 = vsel %vm310_vm12, %v1511_v45, %v307_v41  ;;  %v334_v7 = vmul.f32 %v1515_v0, %v333_v4  ;;  %v458_v45 = vld [vmem:[%s2256_s9 + $0x8] sm:$0xff]  ;;  %vm810_vm12 = vcmask 1043456  }
 0x14c   :  { %1330 = vmatmul.msk.bf16.vlgmr.msra.gmra.mxu0 %vm166_vm0, %v392_v5  ;;  %1350 = vmatmul.msk.bf16.vlgmr.msra.gmra.mxu2 %vm166_vm0, %v392_v5  ;;  %v364_v10 = vmul.f32 %v311_v6, %v1917_v44  ;;  %v387_v44 = vadd.f32 %v1982_v59, %v376_v17  ;;  %v331_v23 = vsel %vm330_vm4, %v1513_v61, %v327_v21  ;;  %vm604_vm4 = vcmask 1047559  }
 0x14d   :  { %v335_v11 = vmul.f32 0.5, %v334_v7  ;;  %v366_v26 = vmul.f32 %v331_v23, %v1915_v43  ;;  %v460_v43 = vld [vmem:[%s2256_s9 + $0x18] sm:$0xff] }
 0x14e   :  { %v375_v15 = vmul.f32 %v1978_v50, %v364_v10  ;;  %497 = vmatpush.msra.mxu1 %v460_v43  ;;  %1474 = vmatpush.msra.mxu3 %v460_v43 }
 0x14f   :  { %v336_v16 = vsub.f32 1.5, %v335_v11  ;;  %v377_v28 = vmul.f32 %v1978_v50, %v366_v26 }
 0x150   :  { %v386_v19 = vadd.f32 %v1982_v59, %v375_v15  ;;  %498 = vmatpush.msra.mxu1 %v459_v37  ;;  %1475 = vmatpush.msra.mxu3 %v459_v37 }
 0x151   :  { %v337_v20 = vmul.f32 %v1515_v0, %v336_v16  ;;  %v388_v31 = vadd.f32 %v1982_v59, %v377_v28 }
 0x152   :  { %v393_v40 = vpack.c.bf16 %v387_v44, %v386_v19  ;;  %499 = vmatpush.msra.mxu1 %v458_v45  ;;  %1476 = vmatpush.msra.mxu3 %v458_v45 }
 0x153   :  { %v341_v22 = vsel %vm340_vm3, %v1515_v0, %v337_v20  ;;  %vm602_vm3 = vcmask 1046534  }
 0x154   :  { %v367_v25 = vmul.f32 %v341_v22, %v1934_v56  ;;  %v1517_v56 = vpop.eup %1516  ;;  %500 = vmatpush.msra.mxu1 %v457_v47  ;;  %1477 = vmatpush.msra.mxu3 %v457_v47  ;;  %v1734_v22 = vmov 0.0  }
 0x155   :  { %v343_v36 = vmul.f32 %v1517_v56, %v280_v35  ;;  %vm349_vm6 = vweird.f32 %v1517_v56  ;;  %165 = vst.msk [vmem:[#allocation3] sm:$0xff] %vm163_vm11, %v1734_v22 }
 0x156   :  { %v378_v27 = vmul.f32 %v1978_v50, %v367_v25  ;;  %vm350_vm7 = vmor %vm348_vm5, %vm349_vm6  ;;  %167 = vst.msk [vmem:[#allocation4] sm:$0xff] %vm166_vm0, %v1734_v22 }
 0x157   :  { %v344_v38 = vmul.f32 %v1517_v56, %v343_v36 }
 0x158   :  { %v389_v30 = vadd.f32 %v1982_v59, %v378_v27 }
 0x159   :  { %v345_v48 = vmul.f32 0.5, %v344_v38 }
 0x15a   :  { %v394_v32 = vpack.c.bf16 %v389_v30, %v388_v31 }
 0x15b   :  { %v346_v49 = vsub.f32 1.5, %v345_v48 }
 0x15c   :  { %1331 = vmatmul.msk.bf16.gmra.mxu0 %vm166_vm0, %v393_v40  ;;  %1351 = vmatmul.msk.bf16.gmra.mxu2 %vm166_vm0, %v393_v40  ;;  %v1733_v40 = vmov -1e+30  }
 0x15d   :  { %v347_v52 = vmul.f32 %v1517_v56, %v346_v49  ;;  %164 = vst.msk [vmem:[#allocation2] sm:$0xff] %vm163_vm11, %v1733_v40 }
 0x15f   :  { %v351_v57 = vsel %vm350_vm7, %v1517_v56, %v347_v52 }
 0x160   :  { %v368_v29 = vmul.f32 %v351_v57, %v1930_v54  ;;  %v1493_v54 = vld [vmem:[#allocation10] ss:$0 sm:$0xff] }
 0x162   :  { %v379_v0 = vmul.f32 %v1978_v50, %v368_v29 }
 0x164   :  { %v390_v1 = vadd.f32 %v1982_v59, %v379_v0 }
 0x16c   :  { %1332 = vmatmul.msk.bf16.gmra.mxu0 %vm166_vm0, %v394_v32  ;;  %1352 = vmatmul.msk.bf16.gmra.mxu2 %vm166_vm0, %v394_v32 }
 0x1a8   :  { %v265_v39 = vpop.xlane.xlu0 %264 }
 0x1a9   :  { %v273_v42 = vmul.f32 %v265_v39, %v1896_v24 }
 0x1ab   :  { %v281_v46 = vadd.f32 1e-05, %v273_v42 }
 0x1ad   :  { %1518 = vrsqrt.f32 %v281_v46  ;;  %vm358_vm9 = vweird.f32 %v281_v46 }
 0x1b3   :  { %v1519_v51 = vpop.eup %1518 }
 0x1b4   :  { %v353_v53 = vmul.f32 %v1519_v51, %v281_v46  ;;  %vm359_vm8 = vweird.f32 %v1519_v51 }
 0x1b5   :  { %vm360_vm10 = vmor %vm358_vm9, %vm359_vm8 }
 0x1b6   :  { %v354_v55 = vmul.f32 %v1519_v51, %v353_v53 }
 0x1b8   :  { %v355_v58 = vmul.f32 0.5, %v354_v55 }
 0x1ba   :  { %v356_v60 = vsub.f32 1.5, %v355_v58  ;;  %v785_v58 = vld [vmem:[%s2257_s10] sm:$0xf] }
 0x1bb   :  { %1354 = vmatpush.msk.msrb.mxu3 %vm810_vm12, %v785_v58  ;;  %1363 = vmatpush.msk.msrb.mxu2 %vm810_vm12, %v785_v58 }
 0x1bc   :  { %v357_v61 = vmul.f32 %v1519_v51, %v356_v60 }
 0x1be   :  { %v361_v62 = vsel %vm360_vm10, %v1519_v51, %v357_v61 }
 0x1bf   :  { %v369_v63 = vmul.f32 %v361_v62, %v1960_v14 }
 0x1c1   :  { %v380_v41 = vmul.f32 %v1978_v50, %v369_v63 }
 0x1c3   :  { %v391_v2 = vadd.f32 %v1982_v59, %v380_v41 }
 0x1c5   :  { %v395_v3 = vpack.c.bf16 %v391_v2, %v390_v1 }
 0x1c7   :  { %1333 = vmatmul.msk.bf16.gmra.mxu0 %vm166_vm0, %v395_v3  ;;  %1353 = vmatmul.msk.bf16.gmra.mxu2 %vm166_vm0, %v395_v3 }
 0x1c9   :  { %v437_v4 = vpop.f32.mrf.mxu0 }
 0x1ca   :  { %v438_v5 = vadd.f32 %v1493_v54, %v437_v4 }
 0x1cc   :  { %1334 = vmatmul.msk.f32.vlgmr.msra.gmra.mxu1 %vm166_vm0, %v438_v5 }
 0x1d1   :  { %v439_v6 = vpop.f32.mrf.mxu0 }
 0x1d2   :  { %v440_v14 = vadd.f32 %v1493_v54, %v439_v6 }
 0x1d4   :  { %1335 = vmatmul.msk.f32.gmra.mxu1 %vm166_vm0, %v440_v14 }
 0x1d9   :  { %v442_v7 = vpop.f32.mrf.mxu0 }
 0x1da   :  { %v443_v50 = vadd.f32 %v1493_v54, %v442_v7 }
 0x1dc   :  { %1336 = vmatmul.msk.f32.gmra.mxu1 %vm166_vm0, %v443_v50 }
 0x1e1   :  { %v444_v8 = vpop.f32.mrf.mxu0 }
 0x1e2   :  { %v445_v59 = vadd.f32 %v1493_v54, %v444_v8 }
 0x1e4   :  { %1337 = vmatmul.msk.f32.gmra.mxu1 %vm166_vm0, %v445_v59 }
 0x1e9   :  { %v447_v9 = vpop.f32.mrf.mxu0 }
 0x1ea   :  { %v448_v10 = vadd.f32 %v1493_v54, %v447_v9 }
 0x1ec   :  { %1338 = vmatmul.msk.f32.gmra.mxu1 %vm166_vm0, %v448_v10 }
 0x1f1   :  { %v449_v11 = vpop.f32.mrf.mxu0 }
 0x1f2   :  { %v450_v12 = vadd.f32 %v1493_v54, %v449_v11 }
 0x1f4   :  { %1339 = vmatmul.msk.f32.gmra.mxu1 %vm166_vm0, %v450_v12 }
 0x244   :  { %v452_v13 = vpop.f32.mrf.mxu0 }
 0x245   :  { %v453_v15 = vadd.f32 %v1493_v54, %v452_v13 }
 0x247   :  { %1340 = vmatmul.msk.f32.gmra.mxu1 %vm166_vm0, %v453_v15 }
 0x249   :  { %v2041_v18 = vpop.f32.mrf.mxu1 }
 0x24a   :  { %v528_v27 = vsel %vm163_vm11, %v2041_v18, -inf }
 0x24b   :  { %v529_v34 = vrot.slane %v528_v27, 4 }
 0x24c   :  { %v454_v16 = vpop.f32.mrf.mxu0 }
 0x24d   :  { %v455_v17 = vadd.f32 %v1493_v54, %v454_v16  ;;  %v530_v45 = vmax.f32 %v528_v27, %v529_v34 }
 0x24f   :  { %1341 = vmatmul.msk.f32.vlgmr.msra.gmra.mxu3 %vm166_vm0, %v455_v17  ;;  %v531_v53 = vrot.slane %v530_v45, 2 }
 0x251   :  { %v2043_v19 = vpop.f32.mrf.mxu1  ;;  %v532_v63 = vmax.f32 %v530_v45, %v531_v53 }
 0x252   :  { %v535_v25 = vsel %vm163_vm11, %v2043_v19, -inf }
 0x253   :  { %v536_v30 = vrot.slane %v535_v25, 4  ;;  %v533_v6 = vrot.slane %v532_v63, 1 }
 0x255   :  { %v537_v37 = vmax.f32 %v535_v25, %v536_v30  ;;  %v534_v12 = vmax.f32 %v532_v63, %v533_v6 }
 0x257   :  { %v538_v48 = vrot.slane %v537_v37, 2 }
 0x259   :  { %v2045_v20 = vpop.f32.mrf.mxu1  ;;  %v539_v60 = vmax.f32 %v537_v37, %v538_v48 }
 0x25a   :  { %v542_v26 = vsel %vm163_vm11, %v2045_v20, -inf }
 0x25b   :  { %v543_v32 = vrot.slane %v542_v26, 4  ;;  %v540_v1 = vrot.slane %v539_v60, 1 }
 0x25d   :  { %v544_v39 = vmax.f32 %v542_v26, %v543_v32  ;;  %v541_v8 = vmax.f32 %v539_v60, %v540_v1  ;;  %v526_v32 = vld [vmem:[#allocation2] sm:$0xff] }
 0x25f   :  { %v545_v51 = vrot.slane %v544_v39, 2  ;;  %v593_v17 = vsel %vm592_vm13, %v541_v8, %v534_v12 }
 0x261   :  { %v2047_v44 = vpop.f32.mrf.mxu1  ;;  %v546_v61 = vmax.f32 %v544_v39, %v545_v51 }
 0x262   :  { %v549_v28 = vsel %vm163_vm11, %v2047_v44, -inf }
 0x263   :  { %v550_v35 = vrot.slane %v549_v28, 4  ;;  %v547_v54 = vrot.slane %v546_v61, 1 }
 0x265   :  { %v551_v46 = vmax.f32 %v549_v28, %v550_v35  ;;  %v548_v10 = vmax.f32 %v546_v61, %v547_v54 }
 0x267   :  { %v552_v55 = vrot.slane %v551_v46, 2  ;;  %v595_v25 = vsel %vm594_vm14, %v548_v10, %v593_v17 }
 0x269   :  { %v2049_v21 = vpop.f32.mrf.mxu1  ;;  %v553_v0 = vmax.f32 %v551_v46, %v552_v55 }
 0x26a   :  { %v556_v31 = vsel %vm163_vm11, %v2049_v21, -inf }
 0x26b   :  { %v557_v56 = vrot.slane %v556_v31, 4  ;;  %v554_v14 = vrot.slane %v553_v0, 1 }
 0x26d   :  { %v558_v47 = vmax.f32 %v556_v31, %v557_v56  ;;  %v555_v13 = vmax.f32 %v553_v0, %v554_v14  ;;  %v967_v0 = vld [vmem:[%s2257_s10] sm:$0xf] }
 0x26e   :  { %1365 = vmatpush.msk.msrb.mxu0 %vm810_vm12, %v967_v0 }
 0x26f   :  { %v559_v57 = vrot.slane %v558_v47, 2  ;;  %v597_v27 = vsel %vm596_vm15, %v555_v13, %v595_v25 }
 0x271   :  { %v2054_v23 = vpop.f32.mrf.mxu1  ;;  %v560_v41 = vmax.f32 %v558_v47, %v559_v57 }
 0x272   :  { %v563_v33 = vsel %vm163_vm11, %v2054_v23, -inf }
 0x273   :  { %v564_v38 = vrot.slane %v563_v33, 4  ;;  %v561_v50 = vrot.slane %v560_v41, 1 }
 0x275   :  { %v565_v49 = vmax.f32 %v563_v33, %v564_v38  ;;  %v562_v16 = vmax.f32 %v560_v41, %v561_v50 }
 0x277   :  { %v566_v29 = vrot.slane %v565_v49, 2  ;;  %v599_v30 = vsel %vm598_vm1, %v562_v16, %v597_v27 }
 0x279   :  { %v567_v2 = vmax.f32 %v565_v49, %v566_v29 }
 0x27b   :  { %v568_v59 = vrot.slane %v567_v2, 1 }
 0x27d   :  { %v569_v40 = vmax.f32 %v567_v2, %v568_v59 }
 0x27f   :  { %v601_v31 = vsel %vm600_vm2, %v569_v40, %v599_v30 }
 0x2c4   :  { %v2068_v43 = vpop.f32.mrf.mxu1 }
 0x2c5   :  { %v570_v36 = vsel %vm163_vm11, %v2068_v43, -inf }
 0x2c6   :  { %v571_v42 = vrot.slane %v570_v36, 4 }
 0x2c8   :  { %v572_v52 = vmax.f32 %v570_v36, %v571_v42 }
 0x2ca   :  { %v573_v62 = vrot.slane %v572_v52, 2 }
 0x2cc   :  { %v574_v4 = vmax.f32 %v572_v52, %v573_v62 }
 0x2ce   :  { %v575_v11 = vrot.slane %v574_v4, 1 }
 0x2d0   :  { %v576_v26 = vmax.f32 %v574_v4, %v575_v11 }
 0x2d2   :  { %v2077_v3 = vpop.f32.mrf.mxu3  ;;  %v603_v34 = vsel %vm602_vm3, %v576_v26, %v601_v31 }
 0x2d3   :  { %v577_v5 = vsel %vm163_vm11, %v2077_v3, -inf }
 0x2d4   :  { %v578_v7 = vrot.slane %v577_v5, 4 }
 0x2d6   :  { %v579_v9 = vmax.f32 %v577_v5, %v578_v7 }
 0x2d8   :  { %v580_v15 = vrot.slane %v579_v9, 2 }
 0x2da   :  { %v581_v22 = vmax.f32 %v579_v9, %v580_v15 }
 0x2dc   :  { %v582_v28 = vrot.slane %v581_v22, 1 }
 0x2de   :  { %v583_v33 = vmax.f32 %v581_v22, %v582_v28 }
 0x2e0   :  { %v605_v35 = vsel %vm604_vm4, %v583_v33, %v603_v34 }
 0x2e1   :  { %v607_v56 = vmax.f32 %v526_v32, %v605_v35 }
 0x2e3   :  { %v608_v36 = vsub.f32 %v526_v32, %v607_v56  ;;  %v618_v37 = vrot.slane %v607_v56, 7  ;;  %735 = vst.msk [vmem:[#allocation2] sm:$0xff] %vm163_vm11, %v607_v56  ;;  %v619_v38 = vperm.slane %v607_v56, 0  ;;  %v612_v39 = vrot.slane %v607_v56, 1 }
 0x2e4   :  { %v613_v42 = vrot.slane %v607_v56, 2  ;;  %v614_v45 = vrot.slane %v607_v56, 3  ;;  %v615_v46 = vrot.slane %v607_v56, 4  ;;  %v616_v47 = vrot.slane %v607_v56, 5 }
 0x2e5   :  { %v609_v48 = vmul.f32 1.442695, %v608_v36  ;;  %v626_v49 = vperm.slane %v618_v37, 0  ;;  %v635_v51 = vsub.f32 %v2041_v18, %v619_v38  ;;  %v620_v52 = vperm.slane %v612_v39, 0 }
 0x2e6   :  { %v621_v53 = vperm.slane %v613_v42, 0  ;;  %v622_v55 = vperm.slane %v614_v45, 0  ;;  %v617_v57 = vrot.slane %v607_v56, 6  ;;  %v623_v58 = vperm.slane %v615_v46, 0 }
 0x2e7   :  { %1520 = vpow2.f32 %v609_v48  ;;  %v642_v60 = vsub.f32 %v2077_v3, %v626_v49  ;;  %v643_v29 = vmul.f32 1.442695, %v635_v51  ;;  %v636_v61 = vsub.f32 %v2043_v19, %v620_v52 }
 0x2e8   :  { %v637_v62 = vsub.f32 %v2045_v20, %v621_v53  ;;  %v638_v63 = vsub.f32 %v2047_v44, %v622_v55  ;;  %v624_v18 = vperm.slane %v616_v47, 0  ;;  %v625_v41 = vperm.slane %v617_v57, 0 }
 0x2e9   :  { %v657_v1 = vmul.f32 1.442695, %v642_v60  ;;  %1522 = vpow2.f32 %v643_v29  ;;  %v645_v2 = vmul.f32 1.442695, %v636_v61  ;;  %v639_v3 = vsub.f32 %v2049_v21, %v623_v58 }
 0x2ea   :  { %v647_v54 = vmul.f32 1.442695, %v637_v62  ;;  %v649_v4 = vmul.f32 1.442695, %v638_v63  ;;  %v640_v19 = vsub.f32 %v2054_v23, %v624_v18  ;;  %v641_v20 = vsub.f32 %v2068_v43, %v625_v41 }
 0x2eb   :  { %1524 = vpow2.f32 %v657_v1  ;;  %v651_v44 = vmul.f32 1.442695, %v639_v3 }
 0x2ec   :  { %1526 = vpow2.f32 %v645_v2  ;;  %v653_v5 = vmul.f32 1.442695, %v640_v19  ;;  %v655_v14 = vmul.f32 1.442695, %v641_v20 }
 0x2ed   :  { %v2101_v6 = vpop.eup %1520  ;;  %1528 = vpow2.f32 %v647_v54 }
 0x2ee   :  { %1364 = vmatmul.msk.f32.vlgmr.msrb.gmra.mxu2 %vm163_vm11, %v2101_v6  ;;  %1530 = vpow2.f32 %v649_v4 }
 0x2ef   :  { %v1523_v7 = vpop.eup %1522  ;;  %1532 = vpow2.f32 %v651_v44 }
 0x2f0   :  { %v661_v21 = vsel %vm163_vm11, %v1523_v7, 0.0  ;;  %1355 = vmatmul.msk.f32.vlgmr.msrb.gmra.mxu3 %vm163_vm11, %v1523_v7  ;;  %1534 = vpow2.f32 %v653_v5 }
 0x2f1   :  { %v2107_v23 = vpop.eup %1524  ;;  %v662_v43 = vrot.slane %v661_v21, 4  ;;  %1536 = vpow2.f32 %v655_v14 }
 0x2f2   :  { %v1527_v50 = vpop.eup %1526  ;;  %v710_v8 = vsel %vm163_vm11, %v2107_v23, 0.0 }
 0x2f3   :  { %v1529_v59 = vpop.eup %1528  ;;  %v711_v9 = vrot.slane %v710_v8, 4  ;;  %v663_v10 = vadd.f32 %v662_v43, %v661_v21  ;;  %v668_v11 = vsel %vm163_vm11, %v1527_v50, 0.0 }
 0x2f4   :  { %v2112_v12 = vpop.eup %1530  ;;  %v669_v13 = vrot.slane %v668_v11, 4  ;;  %v675_v15 = vsel %vm163_vm11, %v1529_v59, 0.0 }
 0x2f5   :  { %v2115_v16 = vpop.eup %1532  ;;  %v712_v17 = vadd.f32 %v711_v9, %v710_v8  ;;  %v664_v40 = vrot.slane %v663_v10, 2  ;;  %v676_v22 = vrot.slane %v675_v15, 4  ;;  %v682_v25 = vsel %vm163_vm11, %v2112_v12, 0.0 }
 0x2f6   :  { %v2119_v26 = vpop.eup %1534  ;;  %v670_v27 = vadd.f32 %v669_v13, %v668_v11  ;;  %v683_v28 = vrot.slane %v682_v25, 4  ;;  %v689_v30 = vsel %vm163_vm11, %v2115_v16, 0.0 }
 0x2f7   :  { %v1537_v31 = vpop.eup %1536  ;;  %v665_v32 = vadd.f32 %v664_v40, %v663_v10  ;;  %v677_v33 = vadd.f32 %v676_v22, %v675_v15  ;;  %v690_v34 = vrot.slane %v689_v30, 4  ;;  %v696_v36 = vsel %vm163_vm11, %v2119_v26, 0.0 }
 0x2f8   :  { %v671_v35 = vrot.slane %v670_v27, 2  ;;  %1356 = vmatmul.msk.f32.gmra.mxu3 %vm163_vm11, %v1527_v50  ;;  %v684_v56 = vadd.f32 %v683_v28, %v682_v25  ;;  %v703_v37 = vsel %vm163_vm11, %v1537_v31, 0.0  ;;  %v713_v38 = vrot.slane %v712_v17, 2  ;;  %v659_v50 = vld [vmem:[#allocation3] sm:$0xff] }
 0x2f9   :  { %v666_v39 = vrot.slane %v665_v32, 1  ;;  %v678_v42 = vrot.slane %v677_v33, 2  ;;  %v691_v45 = vadd.f32 %v690_v34, %v689_v30  ;;  %v697_v48 = vrot.slane %v696_v36, 4  ;;  %v1494_v34 = vld [vmem:[#allocation11] ss:$0 sm:$0xff] }
 0x2fa   :  { %v672_v46 = vadd.f32 %v671_v35, %v670_v27  ;;  %v685_v47 = vrot.slane %v684_v56, 2  ;;  %v704_v49 = vrot.slane %v703_v37, 4  ;;  %v714_v60 = vadd.f32 %v713_v38, %v712_v17 }
 0x2fb   :  { %v679_v51 = vadd.f32 %v678_v42, %v677_v33  ;;  %v692_v52 = vrot.slane %v691_v45, 2  ;;  %v698_v57 = vadd.f32 %v697_v48, %v696_v36  ;;  %v667_v29 = vadd.f32 %v666_v39, %v665_v32 }
 0x2fc   :  { %v673_v53 = vrot.slane %v672_v46, 1  ;;  %v686_v55 = vadd.f32 %v685_v47, %v684_v56  ;;  %v705_v58 = vadd.f32 %v704_v49, %v703_v37  ;;  %v715_v5 = vrot.slane %v714_v60, 1 }
 0x2fd   :  { %v680_v61 = vrot.slane %v679_v51, 1  ;;  %v693_v62 = vadd.f32 %v692_v52, %v691_v45  ;;  %v699_v18 = vrot.slane %v698_v57, 2 }
 0x2fe   :  { %v674_v63 = vadd.f32 %v673_v53, %v672_v46  ;;  %v687_v0 = vrot.slane %v686_v55, 1  ;;  %v706_v41 = vrot.slane %v705_v58, 2  ;;  %v716_v10 = vadd.f32 %v715_v5, %v714_v60 }
 0x2ff   :  { %v681_v1 = vadd.f32 %v680_v61, %v679_v51  ;;  %v694_v2 = vrot.slane %v693_v62, 1  ;;  %v700_v4 = vadd.f32 %v699_v18, %v698_v57 }
 0x300   :  { %v725_v3 = vsel %vm592_vm13, %v674_v63, %v667_v29  ;;  %1357 = vmatmul.msk.f32.gmra.mxu3 %vm163_vm11, %v1529_v59  ;;  %v688_v54 = vadd.f32 %v687_v0, %v686_v55  ;;  %v707_v19 = vadd.f32 %v706_v41, %v705_v58  ;;  %v660_v59 = vmul.f32 %v2101_v6, %v659_v50  ;;  %v765_v6 = vpop.f32.mrf.mxu2  ;;  %v1439_v63 = vld [vmem:[%s2258_s11] sm:$0xff] }
 0x301   :  { %v726_v20 = vsel %vm594_vm14, %v681_v1, %v725_v3  ;;  %v695_v44 = vadd.f32 %v694_v2, %v693_v62  ;;  %v701_v7 = vrot.slane %v700_v4, 1 }
 0x302   :  { %v727_v14 = vsel %vm596_vm15, %v688_v54, %v726_v20  ;;  %v708_v21 = vrot.slane %v707_v19, 1 }
 0x303   :  { %v728_v43 = vsel %vm598_vm1, %v695_v44, %v727_v14  ;;  %v702_v8 = vadd.f32 %v701_v7, %v700_v4 }
 0x304   :  { %v709_v9 = vadd.f32 %v708_v21, %v707_v19 }
 0x305   :  { %v729_v11 = vsel %vm600_vm2, %v702_v8, %v728_v43 }
 0x306   :  { %v730_v13 = vsel %vm602_vm3, %v709_v9, %v729_v11 }
 0x307   :  { %v731_v15 = vsel %vm604_vm4, %v716_v10, %v730_v13 }
 0x308   :  { %1358 = vmatmul.msk.f32.gmra.mxu3 %vm163_vm11, %v2112_v12  ;;  %v733_v17 = vadd.f32 %v731_v15, %v660_v59  ;;  %v767_v12 = vpop.f32.mrf.mxu2 }
 0x30a   :  { %734 = vst.msk [vmem:[#allocation3] sm:$0xff] %vm163_vm11, %v733_v17 }
 0x310   :  { %1359 = vmatmul.msk.f32.gmra.mxu3 %vm163_vm11, %v2115_v16  ;;  %v770_v27 = vpop.f32.mrf.mxu2  ;;  %v1440_v16 = vld [vmem:[%s2258_s11 + $0x8] sm:$0xff] }
 0x311   :  { %v965_v40 = vld [vmem:[#allocation3] sm:$0xff]  ;;  %1026 = vmatpush.bf16.msrb.mxu1 %v1440_v16  ;;  %v771_v56 = vadd.f32 %v1494_v34, %v770_v27 }
 0x312   :  { %1538 = vrcp.f32 %v965_v40 }
 0x315   :  { %1027 = vmatpush.bf16.msrb.mxu1 %v1439_v63 }
 0x318   :  { %1360 = vmatmul.msk.f32.gmra.mxu3 %vm163_vm11, %v2119_v26  ;;  %v1539_v22 = vpop.eup %1538  ;;  %v772_v30 = vpop.f32.mrf.mxu2 }
 0x319   :  { %1366 = vmatmul.msk.f32.vlgmr.msrb.gmra.mxu0 %vm163_vm11, %v1539_v22  ;;  %v773_v37 = vadd.f32 %v1494_v34, %v772_v30 }
 0x320   :  { %1361 = vmatmul.msk.f32.gmra.mxu3 %vm163_vm11, %v1537_v31  ;;  %v775_v32 = vpop.f32.mrf.mxu2  ;;  %v768_v31 = vadd.f32 %v1494_v34, %v767_v12 }
 0x321   :  { %v776_v39 = vadd.f32 %v1494_v34, %v775_v32 }
 0x328   :  { %1362 = vmatmul.msk.f32.gmra.mxu3 %vm163_vm11, %v2107_v23  ;;  %v777_v36 = vpop.f32.mrf.mxu2  ;;  %v766_v23 = vadd.f32 %v1494_v34, %v765_v6 }
 0x329   :  { %v778_v48 = vadd.f32 %v1494_v34, %v777_v36 }
 0x330   :  { %v780_v58 = vpop.f32.mrf.mxu2 }
 0x331   :  { %v781_v3 = vadd.f32 %v1494_v34, %v780_v58 }
 0x338   :  { %v782_v50 = vpop.f32.mrf.mxu2 }
 0x339   :  { %v783_v17 = vadd.f32 %v1494_v34, %v782_v50 }
 0x373   :  { %v831_v25 = vpop.f32.mrf.mxu3 }
 0x374   :  { %v855_v45 = vmul.f32 %v831_v25, %v766_v23 }
 0x376   :  { %v863_v53 = vsel %vm166_vm0, %v855_v45, 0.0 }
 0x377   :  { %v864_v0 = vrot.slane %v863_v53, 4 }
 0x379   :  { %v865_v4 = vadd.f32 %v864_v0, %v863_v53 }
 0x37b   :  { %v834_v28 = vpop.f32.mrf.mxu3  ;;  %v866_v8 = vrot.slane %v865_v4, 2 }
 0x37c   :  { %v856_v38 = vmul.f32 %v834_v28, %v768_v31 }
 0x37d   :  { %v867_v22 = vadd.f32 %v866_v8, %v865_v4  ;;  %v1495_v4 = vld [vmem:[%s2259_s12] ss:$0 sm:$0xff] }
 0x37e   :  { %v870_v49 = vsel %vm166_vm0, %v856_v38, 0.0 }
 0x37f   :  { %v871_v60 = vrot.slane %v870_v49, 4 }
 0x381   :  { %v872_v1 = vadd.f32 %v871_v60, %v870_v49 }
 0x383   :  { %v837_v26 = vpop.f32.mrf.mxu3  ;;  %v873_v14 = vrot.slane %v872_v1, 2 }
 0x384   :  { %v857_v42 = vmul.f32 %v837_v26, %v771_v56 }
 0x385   :  { %v874_v59 = vadd.f32 %v873_v14, %v872_v1 }
 0x386   :  { %v877_v51 = vsel %vm166_vm0, %v857_v42, 0.0 }
 0x387   :  { %v878_v61 = vrot.slane %v877_v51, 4  ;;  %v875_v16 = vrot.slane %v874_v59, 1 }
 0x389   :  { %v879_v54 = vadd.f32 %v878_v61, %v877_v51  ;;  %v876_v23 = vadd.f32 %v875_v16, %v874_v59  ;;  %v1450_v59 = vld [vmem:[%s2264_s17 + $0x38] sm:$0xff] }
 0x38a   :  { %1216 = vmatpush.bf16.msra.mxu3 %v1450_v59 }
 0x38b   :  { %v840_v33 = vpop.f32.mrf.mxu3  ;;  %v880_v21 = vrot.slane %v879_v54, 2 }
 0x38c   :  { %v858_v46 = vmul.f32 %v840_v33, %v773_v37 }
 0x38d   :  { %v881_v40 = vadd.f32 %v880_v21, %v879_v54 }
 0x38e   :  { %v884_v55 = vsel %vm166_vm0, %v858_v46, 0.0 }
 0x38f   :  { %v885_v18 = vrot.slane %v884_v55, 4  ;;  %v882_v26 = vrot.slane %v881_v40, 1 }
 0x391   :  { %v886_v19 = vadd.f32 %v885_v18, %v884_v55  ;;  %v883_v38 = vadd.f32 %v882_v26, %v881_v40  ;;  %v939_v55 = vpop.f32.mrf.mxu2 }
 0x393   :  { %v843_v35 = vpop.f32.mrf.mxu3  ;;  %v887_v9 = vrot.slane %v886_v19, 2 }
 0x394   :  { %v859_v47 = vmul.f32 %v843_v35, %v776_v39  ;;  %v868_v35 = vrot.slane %v867_v22, 1 }
 0x395   :  { %v888_v6 = vadd.f32 %v887_v9, %v886_v19  ;;  %v1496_v19 = vld [vmem:[%s2286_s25] ss:$0 sm:$0xff]  ;;  %s2287_s25 = sld [smem:[#allocation23_spill]] }
 0x396   :  { %v891_v29 = vsel %vm166_vm0, %v859_v47, 0.0  ;;  %v869_v42 = vadd.f32 %v868_v35, %v867_v22  ;;  %v991_v1 = vpop.f32.mrf.mxu0  ;;  %v1499_v35 = vld [vmem:[%s2263_s16] ss:$0 sm:$0xff] }
 0x397   :  { %v892_v41 = vrot.slane %v891_v29, 4  ;;  %v889_v31 = vrot.slane %v888_v6, 1 }
 0x399   :  { %v893_v44 = vadd.f32 %v892_v41, %v891_v29  ;;  %v890_v45 = vadd.f32 %v889_v31, %v888_v6 }
 0x39b   :  { %v846_v52 = vpop.f32.mrf.mxu3  ;;  %v894_v11 = vrot.slane %v893_v44, 2 }
 0x39c   :  { %v860_v57 = vmul.f32 %v846_v52, %v778_v48  ;;  %v952_v48 = vsel %vm592_vm13, %v876_v23, %v869_v42  ;;  %v1449_v23 = vld [vmem:[%s2264_s17 + $0x30] sm:$0xff] }
 0x39d   :  { %v895_v27 = vadd.f32 %v894_v11, %v893_v44  ;;  %v953_v52 = vsel %vm594_vm14, %v883_v38, %v952_v48  ;;  %v1441_v11 = vld [vmem:[%s2262_s15] sm:$0xff]  ;;  %1217 = vmatpush.bf16.msra.mxu3 %v1449_v23 }
 0x39e   :  { %v898_v62 = vsel %vm166_vm0, %v860_v57, 0.0  ;;  %v942_v57 = vld [vmem:[#allocation4] sm:$0xff]  ;;  %v954_v58 = vsel %vm596_vm15, %v890_v45, %v953_v52  ;;  %v1447_v45 = vld [vmem:[%s2264_s17 + $0x20] sm:$0xff] }
 0x39f   :  { %v899_v2 = vrot.slane %v898_v62, 4  ;;  %v896_v36 = vrot.slane %v895_v27, 1  ;;  %v943_v63 = vmul.f32 %v942_v57, %v939_v55 }
 0x3a1   :  { %v900_v7 = vadd.f32 %v899_v2, %v898_v62  ;;  %v897_v47 = vadd.f32 %v896_v36, %v895_v27 }
 0x3a3   :  { %v849_v20 = vpop.f32.mrf.mxu3  ;;  %v901_v13 = vrot.slane %v900_v7, 2  ;;  %v955_v29 = vsel %vm598_vm1, %v897_v47, %v954_v58  ;;  %v1444_v58 = vld [vmem:[%s2264_s17 + $0x8] sm:$0xff] }
 0x3a4   :  { %v861_v5 = vmul.f32 %v849_v20, %v781_v3 }
 0x3a5   :  { %v902_v30 = vadd.f32 %v901_v13, %v900_v7 }
 0x3a6   :  { %v905_v43 = vsel %vm166_vm0, %v861_v5, 0.0 }
 0x3a7   :  { %v906_v10 = vrot.slane %v905_v43, 4  ;;  %v903_v37 = vrot.slane %v902_v30, 1 }
 0x3a9   :  { %v907_v15 = vadd.f32 %v906_v10, %v905_v43  ;;  %v904_v49 = vadd.f32 %v903_v37, %v902_v30  ;;  %v1442_v10 = vld [vmem:[%s2262_s15 + $0x8] sm:$0xff] }
 0x3aa   :  { %1100 = vmatpush.bf16.msra.mxu2 %v1442_v10 }
 0x3ab   :  { %v908_v12 = vrot.slane %v907_v15, 2  ;;  %v852_v25 = vpop.f32.mrf.mxu3  ;;  %v956_v61 = vsel %vm600_vm2, %v904_v49, %v955_v29 }
 0x3ac   :  { %v862_v28 = vmul.f32 %v852_v25, %v783_v17 }
 0x3ad   :  { %v909_v32 = vadd.f32 %v908_v12, %v907_v15 }
 0x3ae   :  { %v912_v33 = vsel %vm166_vm0, %v862_v28, 0.0  ;;  %1101 = vmatpush.bf16.msra.mxu2 %v1441_v11  ;;  %v1497_v28 = vld [vmem:[%s2260_s13] ss:$0 sm:$0xff]  ;;  %v1735_v11 = vmov -1.0  }
 0x3af   :  { %v913_v56 = vrot.slane %v912_v33, 4  ;;  %v910_v39 = vrot.slane %v909_v32, 1 }
 0x3b1   :  { %v914_v34 = vadd.f32 %v913_v56, %v912_v33  ;;  %v911_v53 = vadd.f32 %v910_v39, %v909_v32  ;;  %v1448_v39 = vld [vmem:[%s2264_s17 + $0x28] sm:$0xff] }
 0x3b2   :  { %1218 = vmatpush.bf16.msra.mxu3 %v1448_v39 }
 0x3b3   :  { %v915_v46 = vrot.slane %v914_v34, 2  ;;  %v957_v0 = vsel %vm602_vm3, %v911_v53, %v956_v61  ;;  %v1443_v61 = vld [vmem:[%s2264_s17] sm:$0xff] }
 0x3b5   :  { %v916_v51 = vadd.f32 %v915_v46, %v914_v34  ;;  %v1446_v46 = vld [vmem:[%s2264_s17 + $0x18] sm:$0xff] }
 0x3b6   :  { %1219 = vmatpush.bf16.msra.mxu3 %v1447_v45 }
 0x3b7   :  { %v917_v60 = vrot.slane %v916_v51, 1 }
 0x3b9   :  { %v918_v62 = vadd.f32 %v917_v60, %v916_v51  ;;  %v1445_v51 = vld [vmem:[%s2264_s17 + $0x10] sm:$0xff] }
 0x3ba   :  { %1220 = vmatpush.bf16.msra.mxu3 %v1446_v46 }
 0x3bb   :  { %v958_v18 = vsel %vm604_vm4, %v918_v62, %v957_v0  ;;  %v1452_v62 = vld [vmem:[#allocation13 + $0x8] sm:$0xff] }
 0x3bc   :  { %v960_v41 = vadd.f32 %v958_v18, %v943_v63  ;;  %v1454_v63 = vld [vmem:[#allocation14 + $0x8] sm:$0xff]  ;;  %1289 = vmatpush.bf16.msra.mxu1 %v1452_v62 }
 0x3bd   :  { %1261 = vmatpush.bf16.msra.mxu0 %v1454_v63 }
 0x3be   :  { %961 = vst.msk [vmem:[#allocation4] sm:$0xff] %vm166_vm0, %v960_v41  ;;  %1221 = vmatpush.bf16.msra.mxu3 %v1445_v51 }
 0x3c2   :  { %1222 = vmatpush.bf16.msra.mxu3 %v1444_v58 }
 0x3c5   :  { %v994_v2 = vld [vmem:[#allocation4] sm:$0xff] }
 0x3c6   :  { %v995_v3 = vmul.f32 %v994_v2, %v991_v1  ;;  %v1453_v1 = vld [vmem:[#allocation14] sm:$0xff]  ;;  %v1451_v2 = vld [vmem:[#allocation13] sm:$0xff]  ;;  %1223 = vmatpush.bf16.msra.mxu3 %v1443_v61 }
 0x3c7   :  { %1262 = vmatpush.bf16.msra.mxu0 %v1453_v1  ;;  %1290 = vmatpush.bf16.msra.mxu1 %v1451_v2 }
 0x3c8   :  { %v996_v54 = vpack.c.bf16 %v995_v3, %v995_v3 }
 0x3ca   :  { %1375 = vmatmul.msk.bf16.vlgmr.msrb.gmra.mxu1 %vm166_vm0, %v996_v54 }
 0x447   :  { %v1029_v20 = vpop.f32.mrf.mxu1 }
 0x448   :  { %v1030_v44 = vadd.f32 %v1495_v4, %v1029_v20 }
 0x44a   :  { %v2176_v5 = vadd.f32 %v1496_v19, %v1030_v44  ;;  %v1235_v19 = vld [vmem:[%s2287_s25] sm:$0xf] }
 0x44b   :  { %1425 = vmatmul.msk.bf16.vlgmr.msra.gmra.mxu0 %vm166_vm0, %v1235_v19 }
 0x44c   :  { %v1040_v14 = vsel %vm166_vm0, %v2176_v5, 0.0 }
 0x44d   :  { %1041 = vadd.xlane.f32.xlu1 %v1040_v14 }
 0x44f   :  { %v1031_v7 = vpop.f32.mrf.mxu1 }
 0x4c0   :  { %v1042_v21 = vpop.xlane.xlu1 %1041 }
 0x4c1   :  { %v1043_v43 = vmul.f32 %v1042_v21, %v1896_v24 }
 0x4c3   :  { %v1044_v50 = vsub.f32 %v2176_v5, %v1043_v43 }
 0x4c5   :  { %v1045_v8 = vmul.f32 %v1044_v50, %v1044_v50 }
 0x4c7   :  { %v1046_v9 = vsel %vm166_vm0, %v1045_v8, 0.0 }
 0x4c8   :  { %1047 = vadd.xlane.f32.xlu2 %v1046_v9 }
 0x53b   :  { %v1048_v13 = vpop.xlane.xlu2 %1047 }
 0x53c   :  { %v1049_v15 = vmul.f32 %v1048_v13, %v1896_v24  ;;  %v1498_v24 = vld [vmem:[%s2261_s14] ss:$0 sm:$0xff] }
 0x53e   :  { %v1050_v17 = vadd.f32 1e-05, %v1049_v15 }
 0x540   :  { %1540 = vrsqrt.f32 %v1050_v17  ;;  %vm1057_vm6 = vweird.f32 %v1050_v17 }
 0x546   :  { %v1541_v40 = vpop.eup %1540 }
 0x547   :  { %v1052_v22 = vmul.f32 %v1541_v40, %v1050_v17  ;;  %vm1058_vm5 = vweird.f32 %v1541_v40 }
 0x548   :  { %vm1059_vm7 = vmor %vm1057_vm6, %vm1058_vm5 }
 0x549   :  { %v1053_v6 = vmul.f32 %v1541_v40, %v1052_v22 }
 0x54b   :  { %v1054_v12 = vmul.f32 0.5, %v1053_v6  ;;  %v1264_v6 = vpop.f32.mrf.mxu0 }
 0x54d   :  { %v1055_v25 = vsub.f32 1.5, %v1054_v12 }
 0x54f   :  { %v1056_v27 = vmul.f32 %v1541_v40, %v1055_v25  ;;  %v1500_v25 = vld [vmem:[%s2265_s18] ss:$0 sm:$0xff] }
 0x551   :  { %v1060_v16 = vsel %vm1059_vm7, %v1541_v40, %v1056_v27 }
 0x552   :  { %v1061_v30 = vmul.f32 %v1060_v16, %v1044_v50 }
 0x553   :  { %v1266_v12 = vpop.f32.mrf.mxu0 }
 0x554   :  { %v1065_v26 = vmul.f32 %v1497_v28, %v1061_v30 }
 0x556   :  { %v1069_v32 = vadd.f32 %v1498_v24, %v1065_v26  ;;  %v1501_v26 = vld [vmem:[%s2288_s2] ss:$0 sm:$0xff] }
 0x558   :  { %v1070_v33 = vpack.c.bf16 %v1069_v32, %v1069_v32 }
 0x55a   :  { %1384 = vmatmul.msk.bf16.vlgmr.msra.gmra.mxu2 %vm166_vm0, %v1070_v33 }
 0x5dd   :  { %v1103_v31 = vpop.f32.mrf.mxu2 }
 0x5de   :  { %v2203_v56 = vadd.f32 %v1499_v35, %v1103_v31 }
 0x5e0   :  { %v2206_v36 = vmul.f32 0.70710677, %v2203_v56  ;;  %v1107_v15 = vmul.f32 0.5, %v2203_v56 }
 0x5e2   :  { %v1111_v37 = vand.u32 2147483647, %v2206_v36  ;;  %vm1109_vm12 = vcmp.ge.f32.partialorder %v2206_v36, 0.0 }
 0x5e3   :  { %v1110_v59 = vsel %vm1109_vm12, 1.0, %v1735_v11 }
 0x5e4   :  { %v1112_v34 = vmul.f32 0.3275911, %v1111_v37  ;;  %v1138_v18 = vsub.f32 0.0, %v1111_v37 }
 0x5e5   :  { %v1105_v38 = vpop.f32.mrf.mxu2 }
 0x5e6   :  { %v1113_v42 = vadd.f32 1.0, %v1112_v34  ;;  %v1139_v54 = vmul.f32 %v1138_v18, %v1111_v37 }
 0x5e8   :  { %1542 = vrcp.f32 %v1113_v42  ;;  %v1125_v52 = vand.u32 2147483648, %v1113_v42  ;;  %v1123_v55 = vand.u32 2147483647, %v1113_v42  ;;  %vm1119_vm9 = vweird.f32 %v1113_v42 }
 0x5e9   :  { %v1140_v44 = vmul.f32 1.442695, %v1139_v54 }
 0x5ea   :  { %v1126_v60 = vor.u32 1.1754944e-38, %v1125_v52  ;;  %vm1124_vm11 = vcmp.eq.f32.partialorder %v1123_v55, 8.507059e+37 }
 0x5eb   :  { %1544 = vpow2.f32 %v1140_v44 }
 0x5ee   :  { %v1543_v47 = vpop.eup %1542 }
 0x5ef   :  { %v1115_v48 = vmul.f32 %v1543_v47, %v1113_v42  ;;  %vm1120_vm8 = vweird.f32 %v1543_v47 }
 0x5f0   :  { %vm1121_vm10 = vmor %vm1119_vm9, %vm1120_vm8 }
 0x5f1   :  { %v1116_v49 = vsub.f32 1.0, %v1115_v48  ;;  %v1545_v8 = vpop.eup %1544 }
 0x5f3   :  { %v1117_v53 = vmul.f32 %v1543_v47, %v1116_v49 }
 0x5f5   :  { %v1118_v57 = vadd.f32 %v1543_v47, %v1117_v53 }
 0x5f7   :  { %v1122_v29 = vsel %vm1121_vm10, %v1543_v47, %v1118_v57 }
 0x5f8   :  { %v1127_v0 = vsel %vm1124_vm11, %v1126_v60, %v1122_v29 }
 0x5f9   :  { %v1129_v41 = vmul.f32 1.0614054, %v1127_v0 }
 0x5fb   :  { %v1130_v3 = vadd.f32 -1.4531521, %v1129_v41 }
 0x5fd   :  { %v1131_v4 = vmul.f32 %v1130_v3, %v1127_v0 }
 0x5ff   :  { %v1132_v20 = vadd.f32 1.4214138, %v1131_v4 }
 0x601   :  { %v1133_v14 = vmul.f32 %v1132_v20, %v1127_v0 }
 0x603   :  { %v1134_v7 = vadd.f32 -0.28449672, %v1133_v14 }
 0x605   :  { %v1135_v21 = vmul.f32 %v1134_v7, %v1127_v0 }
 0x607   :  { %v1136_v43 = vadd.f32 0.2548296, %v1135_v21 }
 0x609   :  { %v1137_v50 = vmul.f32 %v1136_v43, %v1127_v0 }
 0x60b   :  { %v1142_v9 = vmul.f32 %v1545_v8, %v1137_v50 }
 0x60d   :  { %v1143_v10 = vsub.f32 1.0, %v1142_v9 }
 0x60f   :  { %v1144_v13 = vmul.f32 %v1143_v10, %v1110_v59 }
 0x611   :  { %v1145_v17 = vadd.f32 1.0, %v1144_v13 }
 0x613   :  { %v1146_v40 = vmul.f32 %v1145_v17, %v1107_v15 }
 0x615   :  { %v1147_v22 = vpack.c.bf16 %v1146_v40, %v1146_v40 }
 0x617   :  { %1224 = vmatmul.bf16.vlgmr.msra.gmra.mxu3 %v1147_v22 }
 0x69a   :  { %v1225_v27 = vpop.f32.mrf.mxu3 }
 0x69b   :  { %v1226_v28 = vadd.f32 %v1500_v25, %v1225_v27 }
 0x69d   :  { %v1229_v16 = vadd.f32 %v1226_v28, %v2176_v5 }
 0x69f   :  { %v1230_v30 = vpack.c.bf16 %v1229_v16, %v1229_v16 }
 0x6a1   :  { %1434 = vmatmul.msk.bf16.vlgmr.msra.gmra.mxu1 %vm166_vm0, %v1230_v30 }
 0x6a2   :  { %v1227_v24 = vpop.f32.mrf.mxu3 }
 0x71e   :  { %v1292_v32 = vpop.f32.mrf.mxu1 }
 0x71f   :  { %v1293_v33 = vadd.f32 %v1292_v32, %v1264_v6 }
 0x721   :  { %v1300_v35 = vadd.f32 %v1501_v26, %v1293_v33 }
 0x723   :  { %1301 = vst [vmem:[#allocation16] sm:$0xff] %v1300_v35 }
 0x724   :  { %1312 = dma.vmem_to_hbm [thread:$0]  %s1308_s21, 128, %s1310_s3, [#allocation7]  }
 0x726   :  { %v1294_v5 = vpop.f32.mrf.mxu1 }
 0x727   :  { %1722 = dma.done.wait [#allocation7], 128  }
 0x728   :  { %1723 = vsyncadd [#allocation7], 4294967168 }
 0x729   :  { %1317 = vsyncpa [#allocation6], 1 }
 0x72a   :  { %1318 = vsyncpa [#allocation9], 1 }
 0x72b   :  { %1319 = vsyncpa [#allocation12], 1 }
 0x72c   :  { %1320 = vsyncpa [#allocation15], 1 }
 0x72d   :  { %1321 = vsyncpa [#allocation7], 1 }

</bundles_post_ra>
